<compile_context>
chip_gen: v5e
topology: v5e:2x2
jax: 0.10.0
libtpu: 0.0.40
codegen_flags: <defaults>
</compile_context>

<pallas_src>
import functools

import jax
import jax.numpy as jnp
from jax import lax
from jax.experimental import pallas as pl
from jax.experimental.pallas import tpu as pltpu

C = 64                                   # hidden channels
PAD = 8                                  # leading zero rows (left halo / pool pad)
_POOLS = (True, True, True, True, False, False, False, False)


def _round8(n):
    return ((n + 7) // 8) * 8


def _fused_kernel(x_ref, w1_ref, b1_ref, wr_ref, br_ref, o_ref,
                  pool_buf, buf_a, buf_b, *, L, B):
    f32 = jnp.float32
    bf16 = jnp.bfloat16

    # Leading zero rows: conv left halo of sample 0 and the pool's left pad.
    pool_buf[0:PAD, :] = jnp.zeros((PAD, C), f32)
    buf_a[0:PAD, :] = jnp.zeros((PAD, C), bf16)
    buf_b[0:PAD, :] = jnp.zeros((PAD, C), bf16)

    def maxpool_into(dst, y, lc, s_in, lc_out, s_out):
        """MaxPool1d(3,2,1) over per-sample chunks of y, repacked into dst.

        y: (B*s_in, C) f32 conv+ReLU output; sample b's valid rows are
        [b*s_in, b*s_in + lc), the rest of each chunk is garbage.  The pooled
        payload (lc_out = lc//2 rows) of sample b lands at dst row
        PAD + b*s_out, followed by (s_out - lc_out) zero rows (the zero gap is
        both the next conv's halo and the next pool's pad; zero == -inf here
        because y >= 0 after ReLU).
        """
        m = B * s_in
        pool_buf[PAD:PAD + m, :] = y
        n_p = m // 2
        p0 = pool_buf[pl.ds(PAD - 1, n_p, stride=2), :]
        p1 = pool_buf[pl.ds(PAD, n_p, stride=2), :]
        p2 = pool_buf[pl.ds(PAD + 1, n_p, stride=2), :]
        # window j == 0 of every sample must not see the row before its
        # payload (previous sample / garbage): mask it instead of issuing
        # small overlapping zero stores.
        first = lax.broadcasted_iota(jnp.int32, (n_p, 1), 0) % (s_in // 2) == 0
        p0 = jnp.where(first, jnp.zeros_like(p0), p0)
        q = jnp.maximum(jnp.maximum(p1, p2), p0).astype(bf16)      # (n_p, C)
        for b in range(B):                       # 8-aligned static dst offsets
            d0 = PAD + b * s_out
            s0 = b * (s_in // 2)
            dst[d0:d0 + lc_out, :] = q[s0:s0 + lc_out, :]
            dst[d0 + lc_out:d0 + s_out, :] = jnp.zeros((s_out - lc_out, C), bf16)

    # ---- layer 1: wrapper-side im2col -> one (B*L, 9) @ (9, 64) MXU pass ----
    y = jnp.dot(x_ref[...], w1_ref[...], preferred_element_type=f32)
    y = jnp.maximum(y + b1_ref[...], 0.0)
    lc = L // 2
    S = _round8(lc + 1)
    maxpool_into(buf_a, y, L, L, lc, S)

    # ---- layers 2..8: Cin = 64, K = 192 im2col fold ----
    # TODO(synk): on v5e the 128-deep MXU runs K=192 as 1.5 passes; a K=128+64
    # split would help there but doubles passes on v6e/v7x, so it is not done.
    src, dst = buf_a, buf_b
    for li in range(1, 8):
        m = B * S
        a0 = src[PAD - 1:PAD - 1 + m, :]
        a1 = src[PAD:PAD + m, :]
        a2 = src[PAD + 1:PAD + 1 + m, :]
        im2col = jnp.concatenate([a0, a1, a2], axis=-1)             # (m, 192) bf16
        y = jnp.dot(im2col, wr_ref[li - 1], preferred_element_type=f32)
        y = jnp.maximum(y + br_ref[li - 1], 0.0)
        if _POOLS[li]:
            lc_out = lc // 2
            s_out = _round8(lc_out + 1)
            maxpool_into(dst, y, lc, S, lc_out, s_out)
            lc, S = lc_out, s_out
            src, dst = dst, src
        elif li < 7:
            # same chunk geometry in and out: zero the garbage tail rows with
            # an iota mask and issue ONE contiguous, sublane-aligned store.
            rowmod = lax.broadcasted_iota(jnp.int32, (m, 1), 0) % S
            y = jnp.where(rowmod < lc, y, 0.0)
            dst[PAD:PAD + m, :] = y.astype(bf16)
            src, dst = dst, src
        else:
            # final layer: lane-dense HBM store -- pack two spatial positions
            # per row so the output is (m//2, 128); the wrapper strips the
            # per-sample tail pairs and does the tiny (c, l) reorder.
            pool_buf[PAD:PAD + m, :] = y
            n_p = m // 2
            even = pool_buf[pl.ds(PAD, n_p, stride=2), :]
            odd = pool_buf[pl.ds(PAD + 1, n_p, stride=2), :]
            o_ref[...] = jnp.concatenate([even, odd], axis=-1).astype(bf16)


def _vmem_limit_bytes():
    try:
        cap = int(pltpu.get_tpu_info().vmem_capacity_bytes)
    except Exception:
        cap = 64 << 20                      # v7x-safe fallback
    return int(min(cap * 3 // 4, 96 << 20))


def _pick_batch_block(N, L, requested, vmem_budget):
    """VMEM-aware batch block; keep >=2 (preferably an even number of) grid
    steps so both v7x TensorCores get work under dimension_semantics parallel."""
    per_sample = 3072 * L                   # rough bound: input x2 buffers,
    # f32 pool staging, bf16 ping/pong, im2col / f32-y compiler temporaries.
    B = max(1, min(requested, N, max(1, (vmem_budget * 2 // 3) // per_sample)))
    while B > 1 and -(-N // B) < 2:
        B -= 1
    if B > 1 and (-(-N // B)) % 2 == 1:
        for cand in range(B - 1, max(0, B // 2 - 1), -1):
            if (-(-N // cand)) % 2 == 0:
                B = cand
                break
    return B


@functools.partial(jax.jit, static_argnames=("batch_block",))
def feature_extraction(x_ncl, params, batch_block=8):
    """x_ncl: (N, 3, L) PyTorch NCL.  Returns (N, 64 * (L // 16)) features."""
    N, cin, L = x_ncl.shape
    assert cin == 3
    # TODO(synk): lengths not divisible by 16 (PyTorch MaxPool1d(3,2,1) yields
    # ceil(n/2) outputs for odd n, which this even-length layout does not model).
    assert L % 16 == 0 and L >= 16
    Lf = L // 16

    vmem_limit = _vmem_limit_bytes()
    B = _pick_batch_block(N, L, batch_block, vmem_limit)
    n_groups = -(-N // B)
    Npad = n_groups * B

    # layer-1 im2col built once in the wrapper (bf16): one K=9 MXU pass
    # in-kernel instead of three K=3 passes, and the kernel input is bf16.
    x = jnp.transpose(x_ncl, (0, 2, 1))                              # (N, L, 3)
    if Npad != N:
        x = jnp.pad(x, ((0, Npad - N), (0, 0), (0, 0)))
    xp = jnp.pad(x, ((0, 0), (1, 1), (0, 0)))
    xcol = jnp.concatenate([xp[:, 0:L], xp[:, 1:L + 1], xp[:, 2:L + 2]],
                           axis=-1).astype(jnp.bfloat16)             # (Npad, L, 9)
    xcol = xcol.reshape(n_groups, B * L, 9)

    w1 = params[0][0].reshape(9, C).astype(jnp.bfloat16)             # (9, 64)
    b1 = params[0][1].reshape(1, C).astype(jnp.float32)
    wr = jnp.stack([p[0].reshape(3 * C, C) for p in params[1:]]
                   ).astype(jnp.bfloat16)                            # (7, 192, 64)
    br = jnp.stack([p[1].reshape(1, C) for p in params[1:]]
                   ).astype(jnp.float32)                             # (7, 1, 64)

    S2 = _round8(L // 2 + 1)                 # largest per-sample chunk stride
    S8 = _round8(Lf + 1)                     # chunk stride of layers 5..8
    kernel = functools.partial(_fused_kernel, L=L, B=B)
    out = pl.pallas_call(
        kernel,
        out_shape=jax.ShapeDtypeStruct((n_groups, B * S8 // 2, 2 * C),
                                       jnp.bfloat16),
        grid_spec=pltpu.PrefetchScalarGridSpec(
            num_scalar_prefetch=0,
            grid=(n_groups,),
            in_specs=[
                pl.BlockSpec((None, B * L, 9), lambda n: (n, 0, 0)),
                pl.BlockSpec((9, C), lambda n: (0, 0)),
                pl.BlockSpec((1, C), lambda n: (0, 0)),
                pl.BlockSpec((7, 3 * C, C), lambda n: (0, 0, 0)),
                pl.BlockSpec((7, 1, C), lambda n: (0, 0, 0)),
            ],
            out_specs=pl.BlockSpec((None, B * S8 // 2, 2 * C),
                                   lambda n: (n, 0, 0)),
            scratch_shapes=[
                pltpu.VMEM((PAD + B * L, C), jnp.float32),           # pool/out staging
                pltpu.VMEM((2 * PAD + B * S2, C), jnp.bfloat16),     # ping
                pltpu.VMEM((2 * PAD + B * S2, C), jnp.bfloat16),     # pong
            ],
        ),
        compiler_params=pltpu.CompilerParams(
            dimension_semantics=("parallel",),
            vmem_limit_bytes=vmem_limit),
    )(xcol, w1, b1, wr, br)

    # unpack the lane-dense pairs-of-positions layout, drop the per-sample tail
    # pairs, then the tiny channels-last -> (c, l) reorder (torch.flatten order).
    pairs = -(-Lf // 2)
    feat = out.reshape(n_groups, B, S8 // 2, 2, C)[:, :, :pairs]
    feat = feat.reshape(Npad, 2 * pairs, C)[:N, :Lf]                 # (N, Lf, 64)
    feat = jnp.transpose(feat, (0, 2, 1)).reshape(N, C * Lf)
    return feat.astype(jnp.float32)


def init_params(key):
    """8 conv layers: conv1 is 3->64, conv2..8 are 64->64, kernel size 3."""
    params = []
    cins = [3] + [64] * 7
    for cin in cins:
        key, kw, kb = jax.random.split(key, 3)
        # stored kernel-major: (K=3, Cin, Cout)
        w = jax.random.normal(kw, (3, cin, C), jnp.float32) / jnp.sqrt(3.0 * cin)
        bb = 0.05 * jax.random.normal(kb, (C,), jnp.float32)
        params.append((w, bb))
    return params


def feature_extraction_ref(x_ncl, params):
    """Pure-JAX reference (lax conv / reduce_window) for validation."""
    x = x_ncl.astype(jnp.float32)
    for (w, b), p in zip(params, _POOLS):
        w_oik = jnp.transpose(w, (2, 1, 0))                          # (Cout, Cin, K)
        y = lax.conv_general_dilated(
            x, w_oik, window_strides=(1,), padding=((1, 1),),
            dimension_numbers=("NCH", "OIH", "NCH"),
            precision=lax.Precision.DEFAULT)
        y = jnp.maximum(y + b[None, :, None], 0.0)
        if p:
            y = lax.reduce_window(
                y, -jnp.inf, lax.max,
                window_dimensions=(1, 1, 3), window_strides=(1, 1, 2),
                padding=((0, 0), (0, 0), (1, 1)))
        x = y
    return x.reshape(x.shape[0], -1)


if __name__ == "__main__":
    key = jax.random.PRNGKey(0)
    key, kp = jax.random.split(key)
    params = init_params(kp)

    # configs exercise: single-sample groups, batched groups (B > 1), batch
    # padding (N % B != 0), and the Lf == 1 (odd) tail-pair path.
    for (n, l, bb) in ((2, 32, 8), (5, 32, 4), (8, 16, 2)):
        key, kx = jax.random.split(key)
        x = jax.random.normal(kx, (n, 3, l), jnp.float32)
        out = jax.block_until_ready(feature_extraction(x, params, batch_block=bb))
        ref = jax.block_until_ready(feature_extraction_ref(x, params))
        assert out.shape == ref.shape == (n, C * (l // 16)), (out.shape, ref.shape)
        err = float(jnp.max(jnp.abs(out - ref)))
        # bf16-MXU kernel vs f32/DEFAULT XLA reference: loose tolerance, but
        # far below any real bug signal (activations are O(1)).
        assert jnp.allclose(out, ref, atol=5e-2, rtol=5e-2), (n, l, bb, err)
    print("KERNEL_OK")
</pallas_src>

<mosaic_0001>
module attributes {stable_mosaic.version = 11 : i64} {
  func.func @_fused_kernel(%arg0: i32, %arg1: memref<1x32x9xbf16, #tpu.memory_space<vmem>>, %arg2: memref<9x64xbf16, #tpu.memory_space<vmem>>, %arg3: memref<1x64xf32, #tpu.memory_space<vmem>>, %arg4: memref<7x192x64xbf16, #tpu.memory_space<vmem>>, %arg5: memref<7x1x64xf32, #tpu.memory_space<vmem>>, %arg6: memref<1x4x128xbf16, #tpu.memory_space<vmem>>, %arg7: memref<40x64xf32, #tpu.memory_space<vmem>>, %arg8: memref<40x64xbf16, #tpu.memory_space<vmem>>, %arg9: memref<40x64xbf16, #tpu.memory_space<vmem>>) attributes {dimension_semantics = [#tpu.dimension_semantics<parallel>], iteration_bounds = array<i64: 2>, scalar_prefetch = 0 : i64, scratch_operands = 3 : i64, tpu.core_type = #tpu.core_type<tc>, window_params = [{transform_indices = @transform_0, window_bounds = array<i64: 1, 32, 9>}, {pipeline_mode = #tpu.pipeline_mode<synchronous>, transform_indices = @transform_1, window_bounds = array<i64: 9, 64>}, {pipeline_mode = #tpu.pipeline_mode<synchronous>, transform_indices = @transform_2, window_bounds = array<i64: 1, 64>}, {pipeline_mode = #tpu.pipeline_mode<synchronous>, transform_indices = @transform_3, window_bounds = array<i64: 7, 192, 64>}, {pipeline_mode = #tpu.pipeline_mode<synchronous>, transform_indices = @transform_4, window_bounds = array<i64: 7, 1, 64>}, {transform_indices = @transform_5, window_bounds = array<i64: 1, 4, 128>}]} {
    %cst = arith.constant 0.000000e+00 : f32
    %0 = vector.broadcast %cst : f32 to vector<8x64xf32>
    %c0 = arith.constant 0 : index
    %c0_0 = arith.constant 0 : index
    %1 = vector.load %arg7[%c0, %c0_0] : memref<40x64xf32, #tpu.memory_space<vmem>>, vector<8x64xf32>
    tpu.vector_store %arg7[%c0, %c0_0], %0 {strides = array<i32>} : memref<40x64xf32, #tpu.memory_space<vmem>>, vector<8x64xf32>,
    %cst_1 = arith.constant 0.000000e+00 : bf16
    %2 = vector.broadcast %cst_1 : bf16 to vector<8x64xbf16>
    %c0_2 = arith.constant 0 : index
    %c0_3 = arith.constant 0 : index
    %3 = vector.load %arg8[%c0_2, %c0_3] : memref<40x64xbf16, #tpu.memory_space<vmem>>, vector<8x64xbf16>
    tpu.vector_store %arg8[%c0_2, %c0_3], %2 {strides = array<i32>} : memref<40x64xbf16, #tpu.memory_space<vmem>>, vector<8x64xbf16>,
    %cst_4 = arith.constant 0.000000e+00 : bf16
    %4 = vector.broadcast %cst_4 : bf16 to vector<8x64xbf16>
    %c0_5 = arith.constant 0 : index
    %c0_6 = arith.constant 0 : index
    %5 = vector.load %arg9[%c0_5, %c0_6] : memref<40x64xbf16, #tpu.memory_space<vmem>>, vector<8x64xbf16>
    tpu.vector_store %arg9[%c0_5, %c0_6], %4 {strides = array<i32>} : memref<40x64xbf16, #tpu.memory_space<vmem>>, vector<8x64xbf16>,
    %c0_7 = arith.constant 0 : index
    %c0_8 = arith.constant 0 : index
    %c0_9 = arith.constant 0 : index
    %6 = vector.load %arg1[%c0_7, %c0_8, %c0_9] : memref<1x32x9xbf16, #tpu.memory_space<vmem>>, vector<1x32x9xbf16>
    %7 = vector.shape_cast %6 : vector<1x32x9xbf16> to vector<32x9xbf16>
    %c0_10 = arith.constant 0 : index
    %c0_11 = arith.constant 0 : index
    %8 = vector.load %arg2[%c0_10, %c0_11] : memref<9x64xbf16, #tpu.memory_space<vmem>>, vector<9x64xbf16>
    %cst_12 = arith.constant dense<0.000000e+00> : vector<32x64xf32>
    %9 = tpu.matmul %7, %8, %cst_12 {dimension_numbers = #tpu.dot_dimension_numbers<[1], [0], [0], [1], [0, 0, 1, 1], [], []>} : vector<32x9xbf16>, vector<9x64xbf16>, vector<32x64xf32> -> vector<32x64xf32>
    %c0_13 = arith.constant 0 : index
    %c0_14 = arith.constant 0 : index
    %10 = vector.load %arg3[%c0_13, %c0_14] : memref<1x64xf32, #tpu.memory_space<vmem>>, vector<1x64xf32>
    %11 = vector.broadcast %10 : vector<1x64xf32> to vector<32x64xf32>
    %12 = arith.addf %9, %11 : vector<32x64xf32>
    %cst_15 = arith.constant 0.000000e+00 : f32
    %13 = vector.broadcast %cst_15 : f32 to vector<32x64xf32>
    %14 = arith.maximumf %12, %13 : vector<32x64xf32>
    %c8 = arith.constant 8 : index
    %c0_16 = arith.constant 0 : index
    %15 = vector.load %arg7[%c8, %c0_16] : memref<40x64xf32, #tpu.memory_space<vmem>>, vector<32x64xf32>
    tpu.vector_store %arg7[%c8, %c0_16], %14 {strides = array<i32>} : memref<40x64xf32, #tpu.memory_space<vmem>>, vector<32x64xf32>,
    %c7 = arith.constant 7 : index
    %c0_17 = arith.constant 0 : index
    %16 = tpu.strided_load %arg7[%c7, %c0_17] {strides = array<i32: 2, 1>} : memref<40x64xf32, #tpu.memory_space<vmem>>, vector<16x64xf32>
    %c8_18 = arith.constant 8 : index
    %c0_19 = arith.constant 0 : index
    %17 = tpu.strided_load %arg7[%c8_18, %c0_19] {strides = array<i32: 2, 1>} : memref<40x64xf32, #tpu.memory_space<vmem>>, vector<16x64xf32>
    %c9 = arith.constant 9 : index
    %c0_20 = arith.constant 0 : index
    %18 = tpu.strided_load %arg7[%c9, %c0_20] {strides = array<i32: 2, 1>} : memref<40x64xf32, #tpu.memory_space<vmem>>, vector<16x64xf32>
    %19 = tpu.iota {dimensions = array<i32: 0>} : vector<16x1xi32>
    %c16_i32 = arith.constant 16 : i32
    %c0_i32 = arith.constant 0 : i32
    %20 = arith.cmpi eq, %c16_i32, %c0_i32 : i32
    %c1_i32 = arith.constant 1 : i32
    %21 = arith.select %20, %c1_i32, %c16_i32 : i32
    %22 = vector.broadcast %21 : i32 to vector<16x1xi32>
    %23 = arith.remsi %19, %22 : vector<16x1xi32>
    %c0_i32_21 = arith.constant 0 : i32
    %24 = vector.broadcast %c0_i32_21 : i32 to vector<16x1xi32>
    %25 = arith.cmpi ne, %23, %24 : vector<16x1xi32>
    %c0_i32_22 = arith.constant 0 : i32
    %26 = vector.broadcast %c0_i32_22 : i32 to vector<16x1xi32>
    %27 = arith.cmpi slt, %23, %26 : vector<16x1xi32>
    %c0_i32_23 = arith.constant 0 : i32
    %28 = arith.cmpi slt, %21, %c0_i32_23 : i32
    %29 = vector.broadcast %28 : i1 to vector<16x1xi1>
    %30 = vector.broadcast %29 : vector<16x1xi1> to vector<16x1xi1>
    %31 = arith.xori %27, %30 : vector<16x1xi1>
    %32 = arith.andi %31, %25 : vector<16x1xi1>
    %33 = vector.broadcast %21 : i32 to vector<16x1xi32>
    %34 = arith.addi %23, %33 : vector<16x1xi32>
    %35 = arith.select %32, %34, %23 : vector<16x1xi1>, vector<16x1xi32>
    %c0_i32_24 = arith.constant 0 : i32
    %36 = vector.broadcast %c0_i32_24 : i32 to vector<16x1xi32>
    %37 = arith.cmpi eq, %35, %36 : vector<16x1xi32>
    %cst_25 = arith.constant 0.000000e+00 : f32
    %38 = vector.broadcast %cst_25 : f32 to vector<16x64xf32>
    %39 = vector.shape_cast %37 : vector<16x1xi1> to vector<16x1xi1>
    %40 = vector.broadcast %39 : vector<16x1xi1> to vector<16x64xi1>
    %41 = arith.select %40, %38, %16 : vector<16x64xi1>, vector<16x64xf32>
    %42 = arith.maximumf %17, %18 : vector<16x64xf32>
    %43 = arith.maximumf %42, %41 : vector<16x64xf32>
    %44 = arith.truncf %43 : vector<16x64xf32> to vector<16x64xbf16>
    %c8_26 = arith.constant 8 : index
    %c0_27 = arith.constant 0 : index
    %45 = vector.load %arg8[%c8_26, %c0_27] : memref<40x64xbf16, #tpu.memory_space<vmem>>, vector<16x64xbf16>
    tpu.vector_store %arg8[%c8_26, %c0_27], %44 {strides = array<i32>} : memref<40x64xbf16, #tpu.memory_space<vmem>>, vector<16x64xbf16>,
    %cst_28 = arith.constant 0.000000e+00 : bf16
    %46 = vector.broadcast %cst_28 : bf16 to vector<8x64xbf16>
    %c24 = arith.constant 24 : index
    %c0_29 = arith.constant 0 : index
    %47 = vector.load %arg8[%c24, %c0_29] : memref<40x64xbf16, #tpu.memory_space<vmem>>, vector<8x64xbf16>
    tpu.vector_store %arg8[%c24, %c0_29], %46 {strides = array<i32>} : memref<40x64xbf16, #tpu.memory_space<vmem>>, vector<8x64xbf16>,
    %c7_30 = arith.constant 7 : index
    %c0_31 = arith.constant 0 : index
    %48 = vector.load %arg8[%c7_30, %c0_31] : memref<40x64xbf16, #tpu.memory_space<vmem>>, vector<24x64xbf16>
    %c8_32 = arith.constant 8 : index
    %c0_33 = arith.constant 0 : index
    %49 = vector.load %arg8[%c8_32, %c0_33] : memref<40x64xbf16, #tpu.memory_space<vmem>>, vector<24x64xbf16>
    %c9_34 = arith.constant 9 : index
    %c0_35 = arith.constant 0 : index
    %50 = vector.load %arg8[%c9_34, %c0_35] : memref<40x64xbf16, #tpu.memory_space<vmem>>, vector<24x64xbf16>
    %51 = tpu.concatenate %48, %49, %50 in 1 : vector<24x64xbf16>, vector<24x64xbf16>, vector<24x64xbf16> -> vector<24x192xbf16>
    %c0_36 = arith.constant 0 : index
    %c0_37 = arith.constant 0 : index
    %c0_38 = arith.constant 0 : index
    %52 = vector.load %arg4[%c0_36, %c0_37, %c0_38] : memref<7x192x64xbf16, #tpu.memory_space<vmem>>, vector<1x192x64xbf16>
    %53 = vector.shape_cast %52 : vector<1x192x64xbf16> to vector<192x64xbf16>
    %cst_39 = arith.constant dense<0.000000e+00> : vector<24x64xf32>
    %54 = tpu.matmul %51, %53, %cst_39 {dimension_numbers = #tpu.dot_dimension_numbers<[1], [0], [0], [1], [0, 0, 1, 1], [], []>} : vector<24x192xbf16>, vector<192x64xbf16>, vector<24x64xf32> -> vector<24x64xf32>
    %c0_40 = arith.constant 0 : index
    %c0_41 = arith.constant 0 : index
    %c0_42 = arith.constant 0 : index
    %55 = vector.load %arg5[%c0_40, %c0_41, %c0_42] : memref<7x1x64xf32, #tpu.memory_space<vmem>>, vector<1x1x64xf32>
    %56 = vector.shape_cast %55 : vector<1x1x64xf32> to vector<1x64xf32>
    %57 = vector.broadcast %56 : vector<1x64xf32> to vector<24x64xf32>
    %58 = arith.addf %54, %57 : vector<24x64xf32>
    %cst_43 = arith.constant 0.000000e+00 : f32
    %59 = vector.broadcast %cst_43 : f32 to vector<24x64xf32>
    %60 = arith.maximumf %58, %59 : vector<24x64xf32>
    %c8_44 = arith.constant 8 : index
    %c0_45 = arith.constant 0 : index
    %61 = vector.load %arg7[%c8_44, %c0_45] : memref<40x64xf32, #tpu.memory_space<vmem>>, vector<24x64xf32>
    tpu.vector_store %arg7[%c8_44, %c0_45], %60 {strides = array<i32>} : memref<40x64xf32, #tpu.memory_space<vmem>>, vector<24x64xf32>,
    %c7_46 = arith.constant 7 : index
    %c0_47 = arith.constant 0 : index
    %62 = tpu.strided_load %arg7[%c7_46, %c0_47] {strides = array<i32: 2, 1>} : memref<40x64xf32, #tpu.memory_space<vmem>>, vector<12x64xf32>
    %c8_48 = arith.constant 8 : index
    %c0_49 = arith.constant 0 : index
    %63 = tpu.strided_load %arg7[%c8_48, %c0_49] {strides = array<i32: 2, 1>} : memref<40x64xf32, #tpu.memory_space<vmem>>, vector<12x64xf32>
    %c9_50 = arith.constant 9 : index
    %c0_51 = arith.constant 0 : index
    %64 = tpu.strided_load %arg7[%c9_50, %c0_51] {strides = array<i32: 2, 1>} : memref<40x64xf32, #tpu.memory_space<vmem>>, vector<12x64xf32>
    %65 = tpu.iota {dimensions = array<i32: 0>} : vector<12x1xi32>
    %c12_i32 = arith.constant 12 : i32
    %c0_i32_52 = arith.constant 0 : i32
    %66 = arith.cmpi eq, %c12_i32, %c0_i32_52 : i32
    %c1_i32_53 = arith.constant 1 : i32
    %67 = arith.select %66, %c1_i32_53, %c12_i32 : i32
    %68 = vector.broadcast %67 : i32 to vector<12x1xi32>
    %69 = arith.remsi %65, %68 : vector<12x1xi32>
    %c0_i32_54 = arith.constant 0 : i32
    %70 = vector.broadcast %c0_i32_54 : i32 to vector<12x1xi32>
    %71 = arith.cmpi ne, %69, %70 : vector<12x1xi32>
    %c0_i32_55 = arith.constant 0 : i32
    %72 = vector.broadcast %c0_i32_55 : i32 to vector<12x1xi32>
    %73 = arith.cmpi slt, %69, %72 : vector<12x1xi32>
    %c0_i32_56 = arith.constant 0 : i32
    %74 = arith.cmpi slt, %67, %c0_i32_56 : i32
    %75 = vector.broadcast %74 : i1 to vector<12x1xi1>
    %76 = vector.broadcast %75 : vector<12x1xi1> to vector<12x1xi1>
    %77 = arith.xori %73, %76 : vector<12x1xi1>
    %78 = arith.andi %77, %71 : vector<12x1xi1>
    %79 = vector.broadcast %67 : i32 to vector<12x1xi32>
    %80 = arith.addi %69, %79 : vector<12x1xi32>
    %81 = arith.select %78, %80, %69 : vector<12x1xi1>, vector<12x1xi32>
    %c0_i32_57 = arith.constant 0 : i32
    %82 = vector.broadcast %c0_i32_57 : i32 to vector<12x1xi32>
    %83 = arith.cmpi eq, %81, %82 : vector<12x1xi32>
    %cst_58 = arith.constant 0.000000e+00 : f32
    %84 = vector.broadcast %cst_58 : f32 to vector<12x64xf32>
    %85 = vector.shape_cast %83 : vector<12x1xi1> to vector<12x1xi1>
    %86 = vector.broadcast %85 : vector<12x1xi1> to vector<12x64xi1>
    %87 = arith.select %86, %84, %62 : vector<12x64xi1>, vector<12x64xf32>
    %88 = arith.maximumf %63, %64 : vector<12x64xf32>
    %89 = arith.maximumf %88, %87 : vector<12x64xf32>
    %90 = arith.truncf %89 : vector<12x64xf32> to vector<12x64xbf16>
    %91 = vector.extract_strided_slice %90 {offsets = [0, 0], sizes = [8, 64], strides = [1, 1]} : vector<12x64xbf16> to vector<8x64xbf16>
    %c8_59 = arith.constant 8 : index
    %c0_60 = arith.constant 0 : index
    %92 = vector.load %arg9[%c8_59, %c0_60] : memref<40x64xbf16, #tpu.memory_space<vmem>>, vector<8x64xbf16>
    tpu.vector_store %arg9[%c8_59, %c0_60], %91 {strides = array<i32>} : memref<40x64xbf16, #tpu.memory_space<vmem>>, vector<8x64xbf16>,
    %cst_61 = arith.constant 0.000000e+00 : bf16
    %93 = vector.broadcast %cst_61 : bf16 to vector<8x64xbf16>
    %c16 = arith.constant 16 : index
    %c0_62 = arith.constant 0 : index
    %94 = vector.load %arg9[%c16, %c0_62] : memref<40x64xbf16, #tpu.memory_space<vmem>>, vector<8x64xbf16>
    tpu.vector_store %arg9[%c16, %c0_62], %93 {strides = array<i32>} : memref<40x64xbf16, #tpu.memory_space<vmem>>, vector<8x64xbf16>,
    %c7_63 = arith.constant 7 : index
    %c0_64 = arith.constant 0 : index
    %95 = vector.load %arg9[%c7_63, %c0_64] : memref<40x64xbf16, #tpu.memory_space<vmem>>, vector<16x64xbf16>
    %c8_65 = arith.constant 8 : index
    %c0_66 = arith.constant 0 : index
    %96 = vector.load %arg9[%c8_65, %c0_66] : memref<40x64xbf16, #tpu.memory_space<vmem>>, vector<16x64xbf16>
    %c9_67 = arith.constant 9 : index
    %c0_68 = arith.constant 0 : index
    %97 = vector.load %arg9[%c9_67, %c0_68] : memref<40x64xbf16, #tpu.memory_space<vmem>>, vector<16x64xbf16>
    %98 = tpu.concatenate %95, %96, %97 in 1 : vector<16x64xbf16>, vector<16x64xbf16>, vector<16x64xbf16> -> vector<16x192xbf16>
    %c1 = arith.constant 1 : index
    %c0_69 = arith.constant 0 : index
    %c0_70 = arith.constant 0 : index
    %99 = vector.load %arg4[%c1, %c0_69, %c0_70] : memref<7x192x64xbf16, #tpu.memory_space<vmem>>, vector<1x192x64xbf16>
    %100 = vector.shape_cast %99 : vector<1x192x64xbf16> to vector<192x64xbf16>
    %cst_71 = arith.constant dense<0.000000e+00> : vector<16x64xf32>
    %101 = tpu.matmul %98, %100, %cst_71 {dimension_numbers = #tpu.dot_dimension_numbers<[1], [0], [0], [1], [0, 0, 1, 1], [], []>} : vector<16x192xbf16>, vector<192x64xbf16>, vector<16x64xf32> -> vector<16x64xf32>
    %c1_72 = arith.constant 1 : index
    %c0_73 = arith.constant 0 : index
    %c0_74 = arith.constant 0 : index
    %102 = vector.load %arg5[%c1_72, %c0_73, %c0_74] : memref<7x1x64xf32, #tpu.memory_space<vmem>>, vector<1x1x64xf32>
    %103 = vector.shape_cast %102 : vector<1x1x64xf32> to vector<1x64xf32>
    %104 = vector.broadcast %103 : vector<1x64xf32> to vector<16x64xf32>
    %105 = arith.addf %101, %104 : vector<16x64xf32>
    %cst_75 = arith.constant 0.000000e+00 : f32
    %106 = vector.broadcast %cst_75 : f32 to vector<16x64xf32>
    %107 = arith.maximumf %105, %106 : vector<16x64xf32>
    %c8_76 = arith.constant 8 : index
    %c0_77 = arith.constant 0 : index
    %108 = vector.load %arg7[%c8_76, %c0_77] : memref<40x64xf32, #tpu.memory_space<vmem>>, vector<16x64xf32>
    tpu.vector_store %arg7[%c8_76, %c0_77], %107 {strides = array<i32>} : memref<40x64xf32, #tpu.memory_space<vmem>>, vector<16x64xf32>,
    %c7_78 = arith.constant 7 : index
    %c0_79 = arith.constant 0 : index
    %109 = tpu.strided_load %arg7[%c7_78, %c0_79] {strides = array<i32: 2, 1>} : memref<40x64xf32, #tpu.memory_space<vmem>>, vector<8x64xf32>
    %c8_80 = arith.constant 8 : index
    %c0_81 = arith.constant 0 : index
    %110 = tpu.strided_load %arg7[%c8_80, %c0_81] {strides = array<i32: 2, 1>} : memref<40x64xf32, #tpu.memory_space<vmem>>, vector<8x64xf32>
    %c9_82 = arith.constant 9 : index
    %c0_83 = arith.constant 0 : index
    %111 = tpu.strided_load %arg7[%c9_82, %c0_83] {strides = array<i32: 2, 1>} : memref<40x64xf32, #tpu.memory_space<vmem>>, vector<8x64xf32>
    %112 = tpu.iota {dimensions = array<i32: 0>} : vector<8x1xi32>
    %c8_i32 = arith.constant 8 : i32
    %c0_i32_84 = arith.constant 0 : i32
    %113 = arith.cmpi eq, %c8_i32, %c0_i32_84 : i32
    %c1_i32_85 = arith.constant 1 : i32
    %114 = arith.select %113, %c1_i32_85, %c8_i32 : i32
    %115 = vector.broadcast %114 : i32 to vector<8x1xi32>
    %116 = arith.remsi %112, %115 : vector<8x1xi32>
    %c0_i32_86 = arith.constant 0 : i32
    %117 = vector.broadcast %c0_i32_86 : i32 to vector<8x1xi32>
    %118 = arith.cmpi ne, %116, %117 : vector<8x1xi32>
    %c0_i32_87 = arith.constant 0 : i32
    %119 = vector.broadcast %c0_i32_87 : i32 to vector<8x1xi32>
    %120 = arith.cmpi slt, %116, %119 : vector<8x1xi32>
    %c0_i32_88 = arith.constant 0 : i32
    %121 = arith.cmpi slt, %114, %c0_i32_88 : i32
    %122 = vector.broadcast %121 : i1 to vector<8x1xi1>
    %123 = vector.broadcast %122 : vector<8x1xi1> to vector<8x1xi1>
    %124 = arith.xori %120, %123 : vector<8x1xi1>
    %125 = arith.andi %124, %118 : vector<8x1xi1>
    %126 = vector.broadcast %114 : i32 to vector<8x1xi32>
    %127 = arith.addi %116, %126 : vector<8x1xi32>
    %128 = arith.select %125, %127, %116 : vector<8x1xi1>, vector<8x1xi32>
    %c0_i32_89 = arith.constant 0 : i32
    %129 = vector.broadcast %c0_i32_89 : i32 to vector<8x1xi32>
    %130 = arith.cmpi eq, %128, %129 : vector<8x1xi32>
    %cst_90 = arith.constant 0.000000e+00 : f32
    %131 = vector.broadcast %cst_90 : f32 to vector<8x64xf32>
    %132 = vector.shape_cast %130 : vector<8x1xi1> to vector<8x1xi1>
    %133 = vector.broadcast %132 : vector<8x1xi1> to vector<8x64xi1>
    %134 = arith.select %133, %131, %109 : vector<8x64xi1>, vector<8x64xf32>
    %135 = arith.maximumf %110, %111 : vector<8x64xf32>
    %136 = arith.maximumf %135, %134 : vector<8x64xf32>
    %137 = arith.truncf %136 : vector<8x64xf32> to vector<8x64xbf16>
    %138 = vector.extract_strided_slice %137 {offsets = [0, 0], sizes = [4, 64], strides = [1, 1]} : vector<8x64xbf16> to vector<4x64xbf16>
    %c8_91 = arith.constant 8 : index
    %c0_92 = arith.constant 0 : index
    %139 = vector.load %arg8[%c8_91, %c0_92] : memref<40x64xbf16, #tpu.memory_space<vmem>>, vector<4x64xbf16>
    tpu.vector_store %arg8[%c8_91, %c0_92], %138 {strides = array<i32>} : memref<40x64xbf16, #tpu.memory_space<vmem>>, vector<4x64xbf16>,
    %cst_93 = arith.constant 0.000000e+00 : bf16
    %140 = vector.broadcast %cst_93 : bf16 to vector<4x64xbf16>
    %c12 = arith.constant 12 : index
    %c0_94 = arith.constant 0 : index
    %141 = vector.load %arg8[%c12, %c0_94] : memref<40x64xbf16, #tpu.memory_space<vmem>>, vector<4x64xbf16>
    tpu.vector_store %arg8[%c12, %c0_94], %140 {strides = array<i32>} : memref<40x64xbf16, #tpu.memory_space<vmem>>, vector<4x64xbf16>,
    %c7_95 = arith.constant 7 : index
    %c0_96 = arith.constant 0 : index
    %142 = vector.load %arg8[%c7_95, %c0_96] : memref<40x64xbf16, #tpu.memory_space<vmem>>, vector<8x64xbf16>
    %c8_97 = arith.constant 8 : index
    %c0_98 = arith.constant 0 : index
    %143 = vector.load %arg8[%c8_97, %c0_98] : memref<40x64xbf16, #tpu.memory_space<vmem>>, vector<8x64xbf16>
    %c9_99 = arith.constant 9 : index
    %c0_100 = arith.constant 0 : index
    %144 = vector.load %arg8[%c9_99, %c0_100] : memref<40x64xbf16, #tpu.memory_space<vmem>>, vector<8x64xbf16>
    %145 = tpu.concatenate %142, %143, %144 in 1 : vector<8x64xbf16>, vector<8x64xbf16>, vector<8x64xbf16> -> vector<8x192xbf16>
    %c2 = arith.constant 2 : index
    %c0_101 = arith.constant 0 : index
    %c0_102 = arith.constant 0 : index
    %146 = vector.load %arg4[%c2, %c0_101, %c0_102] : memref<7x192x64xbf16, #tpu.memory_space<vmem>>, vector<1x192x64xbf16>
    %147 = vector.shape_cast %146 : vector<1x192x64xbf16> to vector<192x64xbf16>
    %cst_103 = arith.constant dense<0.000000e+00> : vector<8x64xf32>
    %148 = tpu.matmul %145, %147, %cst_103 {dimension_numbers = #tpu.dot_dimension_numbers<[1], [0], [0], [1], [0, 0, 1, 1], [], []>} : vector<8x192xbf16>, vector<192x64xbf16>, vector<8x64xf32> -> vector<8x64xf32>
    %c2_104 = arith.constant 2 : index
    %c0_105 = arith.constant 0 : index
    %c0_106 = arith.constant 0 : index
    %149 = vector.load %arg5[%c2_104, %c0_105, %c0_106] : memref<7x1x64xf32, #tpu.memory_space<vmem>>, vector<1x1x64xf32>
    %150 = vector.shape_cast %149 : vector<1x1x64xf32> to vector<1x64xf32>
    %151 = vector.broadcast %150 : vector<1x64xf32> to vector<8x64xf32>
    %152 = arith.addf %148, %151 : vector<8x64xf32>
    %cst_107 = arith.constant 0.000000e+00 : f32
    %153 = vector.broadcast %cst_107 : f32 to vector<8x64xf32>
    %154 = arith.maximumf %152, %153 : vector<8x64xf32>
    %c8_108 = arith.constant 8 : index
    %c0_109 = arith.constant 0 : index
    %155 = vector.load %arg7[%c8_108, %c0_109] : memref<40x64xf32, #tpu.memory_space<vmem>>, vector<8x64xf32>
    tpu.vector_store %arg7[%c8_108, %c0_109], %154 {strides = array<i32>} : memref<40x64xf32, #tpu.memory_space<vmem>>, vector<8x64xf32>,
    %c7_110 = arith.constant 7 : index
    %c0_111 = arith.constant 0 : index
    %156 = tpu.strided_load %arg7[%c7_110, %c0_111] {strides = array<i32: 2, 1>} : memref<40x64xf32, #tpu.memory_space<vmem>>, vector<4x64xf32>
    %c8_112 = arith.constant 8 : index
    %c0_113 = arith.constant 0 : index
    %157 = tpu.strided_load %arg7[%c8_112, %c0_113] {strides = array<i32: 2, 1>} : memref<40x64xf32, #tpu.memory_space<vmem>>, vector<4x64xf32>
    %c9_114 = arith.constant 9 : index
    %c0_115 = arith.constant 0 : index
    %158 = tpu.strided_load %arg7[%c9_114, %c0_115] {strides = array<i32: 2, 1>} : memref<40x64xf32, #tpu.memory_space<vmem>>, vector<4x64xf32>
    %159 = tpu.iota {dimensions = array<i32: 0>} : vector<4x1xi32>
    %c4_i32 = arith.constant 4 : i32
    %c0_i32_116 = arith.constant 0 : i32
    %160 = arith.cmpi eq, %c4_i32, %c0_i32_116 : i32
    %c1_i32_117 = arith.constant 1 : i32
    %161 = arith.select %160, %c1_i32_117, %c4_i32 : i32
    %162 = vector.broadcast %161 : i32 to vector<4x1xi32>
    %163 = arith.remsi %159, %162 : vector<4x1xi32>
    %c0_i32_118 = arith.constant 0 : i32
    %164 = vector.broadcast %c0_i32_118 : i32 to vector<4x1xi32>
    %165 = arith.cmpi ne, %163, %164 : vector<4x1xi32>
    %c0_i32_119 = arith.constant 0 : i32
    %166 = vector.broadcast %c0_i32_119 : i32 to vector<4x1xi32>
    %167 = arith.cmpi slt, %163, %166 : vector<4x1xi32>
    %c0_i32_120 = arith.constant 0 : i32
    %168 = arith.cmpi slt, %161, %c0_i32_120 : i32
    %169 = vector.broadcast %168 : i1 to vector<4x1xi1>
    %170 = vector.broadcast %169 : vector<4x1xi1> to vector<4x1xi1>
    %171 = arith.xori %167, %170 : vector<4x1xi1>
    %172 = arith.andi %171, %165 : vector<4x1xi1>
    %173 = vector.broadcast %161 : i32 to vector<4x1xi32>
    %174 = arith.addi %163, %173 : vector<4x1xi32>
    %175 = arith.select %172, %174, %163 : vector<4x1xi1>, vector<4x1xi32>
    %c0_i32_121 = arith.constant 0 : i32
    %176 = vector.broadcast %c0_i32_121 : i32 to vector<4x1xi32>
    %177 = arith.cmpi eq, %175, %176 : vector<4x1xi32>
    %cst_122 = arith.constant 0.000000e+00 : f32
    %178 = vector.broadcast %cst_122 : f32 to vector<4x64xf32>
    %179 = vector.shape_cast %177 : vector<4x1xi1> to vector<4x1xi1>
    %180 = vector.broadcast %179 : vector<4x1xi1> to vector<4x64xi1>
    %181 = arith.select %180, %178, %156 : vector<4x64xi1>, vector<4x64xf32>
    %182 = arith.maximumf %157, %158 : vector<4x64xf32>
    %183 = arith.maximumf %182, %181 : vector<4x64xf32>
    %184 = arith.truncf %183 : vector<4x64xf32> to vector<4x64xbf16>
    %185 = vector.extract_strided_slice %184 {offsets = [0, 0], sizes = [2, 64], strides = [1, 1]} : vector<4x64xbf16> to vector<2x64xbf16>
    %c8_123 = arith.constant 8 : index
    %c0_124 = arith.constant 0 : index
    %186 = vector.load %arg9[%c8_123, %c0_124] : memref<40x64xbf16, #tpu.memory_space<vmem>>, vector<2x64xbf16>
    tpu.vector_store %arg9[%c8_123, %c0_124], %185 {strides = array<i32>} : memref<40x64xbf16, #tpu.memory_space<vmem>>, vector<2x64xbf16>,
    %cst_125 = arith.constant 0.000000e+00 : bf16
    %187 = vector.broadcast %cst_125 : bf16 to vector<6x64xbf16>
    %c10 = arith.constant 10 : index
    %c0_126 = arith.constant 0 : index
    %188 = vector.load %arg9[%c10, %c0_126] : memref<40x64xbf16, #tpu.memory_space<vmem>>, vector<6x64xbf16>
    tpu.vector_store %arg9[%c10, %c0_126], %187 {strides = array<i32>} : memref<40x64xbf16, #tpu.memory_space<vmem>>, vector<6x64xbf16>,
    %c7_127 = arith.constant 7 : index
    %c0_128 = arith.constant 0 : index
    %189 = vector.load %arg9[%c7_127, %c0_128] : memref<40x64xbf16, #tpu.memory_space<vmem>>, vector<8x64xbf16>
    %c8_129 = arith.constant 8 : index
    %c0_130 = arith.constant 0 : index
    %190 = vector.load %arg9[%c8_129, %c0_130] : memref<40x64xbf16, #tpu.memory_space<vmem>>, vector<8x64xbf16>
    %c9_131 = arith.constant 9 : index
    %c0_132 = arith.constant 0 : index
    %191 = vector.load %arg9[%c9_131, %c0_132] : memref<40x64xbf16, #tpu.memory_space<vmem>>, vector<8x64xbf16>
    %192 = tpu.concatenate %189, %190, %191 in 1 : vector<8x64xbf16>, vector<8x64xbf16>, vector<8x64xbf16> -> vector<8x192xbf16>
    %c3 = arith.constant 3 : index
    %c0_133 = arith.constant 0 : index
    %c0_134 = arith.constant 0 : index
    %193 = vector.load %arg4[%c3, %c0_133, %c0_134] : memref<7x192x64xbf16, #tpu.memory_space<vmem>>, vector<1x192x64xbf16>
    %194 = vector.shape_cast %193 : vector<1x192x64xbf16> to vector<192x64xbf16>
    %cst_135 = arith.constant dense<0.000000e+00> : vector<8x64xf32>
    %195 = tpu.matmul %192, %194, %cst_135 {dimension_numbers = #tpu.dot_dimension_numbers<[1], [0], [0], [1], [0, 0, 1, 1], [], []>} : vector<8x192xbf16>, vector<192x64xbf16>, vector<8x64xf32> -> vector<8x64xf32>
    %c3_136 = arith.constant 3 : index
    %c0_137 = arith.constant 0 : index
    %c0_138 = arith.constant 0 : index
    %196 = vector.load %arg5[%c3_136, %c0_137, %c0_138] : memref<7x1x64xf32, #tpu.memory_space<vmem>>, vector<1x1x64xf32>
    %197 = vector.shape_cast %196 : vector<1x1x64xf32> to vector<1x64xf32>
    %198 = vector.broadcast %197 : vector<1x64xf32> to vector<8x64xf32>
    %199 = arith.addf %195, %198 : vector<8x64xf32>
    %cst_139 = arith.constant 0.000000e+00 : f32
    %200 = vector.broadcast %cst_139 : f32 to vector<8x64xf32>
    %201 = arith.maximumf %199, %200 : vector<8x64xf32>
    %202 = tpu.iota {dimensions = array<i32: 0>} : vector<8x1xi32>
    %c8_i32_140 = arith.constant 8 : i32
    %c0_i32_141 = arith.constant 0 : i32
    %203 = arith.cmpi eq, %c8_i32_140, %c0_i32_141 : i32
    %c1_i32_142 = arith.constant 1 : i32
    %204 = arith.select %203, %c1_i32_142, %c8_i32_140 : i32
    %205 = vector.broadcast %204 : i32 to vector<8x1xi32>
    %206 = arith.remsi %202, %205 : vector<8x1xi32>
    %c0_i32_143 = arith.constant 0 : i32
    %207 = vector.broadcast %c0_i32_143 : i32 to vector<8x1xi32>
    %208 = arith.cmpi ne, %206, %207 : vector<8x1xi32>
    %c0_i32_144 = arith.constant 0 : i32
    %209 = vector.broadcast %c0_i32_144 : i32 to vector<8x1xi32>
    %210 = arith.cmpi slt, %206, %209 : vector<8x1xi32>
    %c0_i32_145 = arith.constant 0 : i32
    %211 = arith.cmpi slt, %204, %c0_i32_145 : i32
    %212 = vector.broadcast %211 : i1 to vector<8x1xi1>
    %213 = vector.broadcast %212 : vector<8x1xi1> to vector<8x1xi1>
    %214 = arith.xori %210, %213 : vector<8x1xi1>
    %215 = arith.andi %214, %208 : vector<8x1xi1>
    %216 = vector.broadcast %204 : i32 to vector<8x1xi32>
    %217 = arith.addi %206, %216 : vector<8x1xi32>
    %218 = arith.select %215, %217, %206 : vector<8x1xi1>, vector<8x1xi32>
    %c2_i32 = arith.constant 2 : i32
    %219 = vector.broadcast %c2_i32 : i32 to vector<8x1xi32>
    %220 = arith.cmpi slt, %218, %219 : vector<8x1xi32>
    %cst_146 = arith.constant 0.000000e+00 : f32
    %221 = vector.shape_cast %220 : vector<8x1xi1> to vector<8x1xi1>
    %222 = vector.broadcast %221 : vector<8x1xi1> to vector<8x64xi1>
    %223 = vector.broadcast %cst_146 : f32 to vector<8x64xf32>
    %224 = arith.select %222, %201, %223 : vector<8x64xi1>, vector<8x64xf32>
    %225 = arith.truncf %224 : vector<8x64xf32> to vector<8x64xbf16>
    %c8_147 = arith.constant 8 : index
    %c0_148 = arith.constant 0 : index
    %226 = vector.load %arg8[%c8_147, %c0_148] : memref<40x64xbf16, #tpu.memory_space<vmem>>, vector<8x64xbf16>
    tpu.vector_store %arg8[%c8_147, %c0_148], %225 {strides = array<i32>} : memref<40x64xbf16, #tpu.memory_space<vmem>>, vector<8x64xbf16>,
    %c7_149 = arith.constant 7 : index
    %c0_150 = arith.constant 0 : index
    %227 = vector.load %arg8[%c7_149, %c0_150] : memref<40x64xbf16, #tpu.memory_space<vmem>>, vector<8x64xbf16>
    %c8_151 = arith.constant 8 : index
    %c0_152 = arith.constant 0 : index
    %228 = vector.load %arg8[%c8_151, %c0_152] : memref<40x64xbf16, #tpu.memory_space<vmem>>, vector<8x64xbf16>
    %c9_153 = arith.constant 9 : index
    %c0_154 = arith.constant 0 : index
    %229 = vector.load %arg8[%c9_153, %c0_154] : memref<40x64xbf16, #tpu.memory_space<vmem>>, vector<8x64xbf16>
    %230 = tpu.concatenate %227, %228, %229 in 1 : vector<8x64xbf16>, vector<8x64xbf16>, vector<8x64xbf16> -> vector<8x192xbf16>
    %c4 = arith.constant 4 : index
    %c0_155 = arith.constant 0 : index
    %c0_156 = arith.constant 0 : index
    %231 = vector.load %arg4[%c4, %c0_155, %c0_156] : memref<7x192x64xbf16, #tpu.memory_space<vmem>>, vector<1x192x64xbf16>
    %232 = vector.shape_cast %231 : vector<1x192x64xbf16> to vector<192x64xbf16>
    %cst_157 = arith.constant dense<0.000000e+00> : vector<8x64xf32>
    %233 = tpu.matmul %230, %232, %cst_157 {dimension_numbers = #tpu.dot_dimension_numbers<[1], [0], [0], [1], [0, 0, 1, 1], [], []>} : vector<8x192xbf16>, vector<192x64xbf16>, vector<8x64xf32> -> vector<8x64xf32>
    %c4_158 = arith.constant 4 : index
    %c0_159 = arith.constant 0 : index
    %c0_160 = arith.constant 0 : index
    %234 = vector.load %arg5[%c4_158, %c0_159, %c0_160] : memref<7x1x64xf32, #tpu.memory_space<vmem>>, vector<1x1x64xf32>
    %235 = vector.shape_cast %234 : vector<1x1x64xf32> to vector<1x64xf32>
    %236 = vector.broadcast %235 : vector<1x64xf32> to vector<8x64xf32>
    %237 = arith.addf %233, %236 : vector<8x64xf32>
    %cst_161 = arith.constant 0.000000e+00 : f32
    %238 = vector.broadcast %cst_161 : f32 to vector<8x64xf32>
    %239 = arith.maximumf %237, %238 : vector<8x64xf32>
    %240 = tpu.iota {dimensions = array<i32: 0>} : vector<8x1xi32>
    %c8_i32_162 = arith.constant 8 : i32
    %c0_i32_163 = arith.constant 0 : i32
    %241 = arith.cmpi eq, %c8_i32_162, %c0_i32_163 : i32
    %c1_i32_164 = arith.constant 1 : i32
    %242 = arith.select %241, %c1_i32_164, %c8_i32_162 : i32
    %243 = vector.broadcast %242 : i32 to vector<8x1xi32>
    %244 = arith.remsi %240, %243 : vector<8x1xi32>
    %c0_i32_165 = arith.constant 0 : i32
    %245 = vector.broadcast %c0_i32_165 : i32 to vector<8x1xi32>
    %246 = arith.cmpi ne, %244, %245 : vector<8x1xi32>
    %c0_i32_166 = arith.constant 0 : i32
    %247 = vector.broadcast %c0_i32_166 : i32 to vector<8x1xi32>
    %248 = arith.cmpi slt, %244, %247 : vector<8x1xi32>
    %c0_i32_167 = arith.constant 0 : i32
    %249 = arith.cmpi slt, %242, %c0_i32_167 : i32
    %250 = vector.broadcast %249 : i1 to vector<8x1xi1>
    %251 = vector.broadcast %250 : vector<8x1xi1> to vector<8x1xi1>
    %252 = arith.xori %248, %251 : vector<8x1xi1>
    %253 = arith.andi %252, %246 : vector<8x1xi1>
    %254 = vector.broadcast %242 : i32 to vector<8x1xi32>
    %255 = arith.addi %244, %254 : vector<8x1xi32>
    %256 = arith.select %253, %255, %244 : vector<8x1xi1>, vector<8x1xi32>
    %c2_i32_168 = arith.constant 2 : i32
    %257 = vector.broadcast %c2_i32_168 : i32 to vector<8x1xi32>
    %258 = arith.cmpi slt, %256, %257 : vector<8x1xi32>
    %cst_169 = arith.constant 0.000000e+00 : f32
    %259 = vector.shape_cast %258 : vector<8x1xi1> to vector<8x1xi1>
    %260 = vector.broadcast %259 : vector<8x1xi1> to vector<8x64xi1>
    %261 = vector.broadcast %cst_169 : f32 to vector<8x64xf32>
    %262 = arith.select %260, %239, %261 : vector<8x64xi1>, vector<8x64xf32>
    %263 = arith.truncf %262 : vector<8x64xf32> to vector<8x64xbf16>
    %c8_170 = arith.constant 8 : index
    %c0_171 = arith.constant 0 : index
    %264 = vector.load %arg9[%c8_170, %c0_171] : memref<40x64xbf16, #tpu.memory_space<vmem>>, vector<8x64xbf16>
    tpu.vector_store %arg9[%c8_170, %c0_171], %263 {strides = array<i32>} : memref<40x64xbf16, #tpu.memory_space<vmem>>, vector<8x64xbf16>,
    %c7_172 = arith.constant 7 : index
    %c0_173 = arith.constant 0 : index
    %265 = vector.load %arg9[%c7_172, %c0_173] : memref<40x64xbf16, #tpu.memory_space<vmem>>, vector<8x64xbf16>
    %c8_174 = arith.constant 8 : index
    %c0_175 = arith.constant 0 : index
    %266 = vector.load %arg9[%c8_174, %c0_175] : memref<40x64xbf16, #tpu.memory_space<vmem>>, vector<8x64xbf16>
    %c9_176 = arith.constant 9 : index
    %c0_177 = arith.constant 0 : index
    %267 = vector.load %arg9[%c9_176, %c0_177] : memref<40x64xbf16, #tpu.memory_space<vmem>>, vector<8x64xbf16>
    %268 = tpu.concatenate %265, %266, %267 in 1 : vector<8x64xbf16>, vector<8x64xbf16>, vector<8x64xbf16> -> vector<8x192xbf16>
    %c5 = arith.constant 5 : index
    %c0_178 = arith.constant 0 : index
    %c0_179 = arith.constant 0 : index
    %269 = vector.load %arg4[%c5, %c0_178, %c0_179] : memref<7x192x64xbf16, #tpu.memory_space<vmem>>, vector<1x192x64xbf16>
    %270 = vector.shape_cast %269 : vector<1x192x64xbf16> to vector<192x64xbf16>
    %cst_180 = arith.constant dense<0.000000e+00> : vector<8x64xf32>
    %271 = tpu.matmul %268, %270, %cst_180 {dimension_numbers = #tpu.dot_dimension_numbers<[1], [0], [0], [1], [0, 0, 1, 1], [], []>} : vector<8x192xbf16>, vector<192x64xbf16>, vector<8x64xf32> -> vector<8x64xf32>
    %c5_181 = arith.constant 5 : index
    %c0_182 = arith.constant 0 : index
    %c0_183 = arith.constant 0 : index
    %272 = vector.load %arg5[%c5_181, %c0_182, %c0_183] : memref<7x1x64xf32, #tpu.memory_space<vmem>>, vector<1x1x64xf32>
    %273 = vector.shape_cast %272 : vector<1x1x64xf32> to vector<1x64xf32>
    %274 = vector.broadcast %273 : vector<1x64xf32> to vector<8x64xf32>
    %275 = arith.addf %271, %274 : vector<8x64xf32>
    %cst_184 = arith.constant 0.000000e+00 : f32
    %276 = vector.broadcast %cst_184 : f32 to vector<8x64xf32>
    %277 = arith.maximumf %275, %276 : vector<8x64xf32>
    %278 = tpu.iota {dimensions = array<i32: 0>} : vector<8x1xi32>
    %c8_i32_185 = arith.constant 8 : i32
    %c0_i32_186 = arith.constant 0 : i32
    %279 = arith.cmpi eq, %c8_i32_185, %c0_i32_186 : i32
    %c1_i32_187 = arith.constant 1 : i32
    %280 = arith.select %279, %c1_i32_187, %c8_i32_185 : i32
    %281 = vector.broadcast %280 : i32 to vector<8x1xi32>
    %282 = arith.remsi %278, %281 : vector<8x1xi32>
    %c0_i32_188 = arith.constant 0 : i32
    %283 = vector.broadcast %c0_i32_188 : i32 to vector<8x1xi32>
    %284 = arith.cmpi ne, %282, %283 : vector<8x1xi32>
    %c0_i32_189 = arith.constant 0 : i32
    %285 = vector.broadcast %c0_i32_189 : i32 to vector<8x1xi32>
    %286 = arith.cmpi slt, %282, %285 : vector<8x1xi32>
    %c0_i32_190 = arith.constant 0 : i32
    %287 = arith.cmpi slt, %280, %c0_i32_190 : i32
    %288 = vector.broadcast %287 : i1 to vector<8x1xi1>
    %289 = vector.broadcast %288 : vector<8x1xi1> to vector<8x1xi1>
    %290 = arith.xori %286, %289 : vector<8x1xi1>
    %291 = arith.andi %290, %284 : vector<8x1xi1>
    %292 = vector.broadcast %280 : i32 to vector<8x1xi32>
    %293 = arith.addi %282, %292 : vector<8x1xi32>
    %294 = arith.select %291, %293, %282 : vector<8x1xi1>, vector<8x1xi32>
    %c2_i32_191 = arith.constant 2 : i32
    %295 = vector.broadcast %c2_i32_191 : i32 to vector<8x1xi32>
    %296 = arith.cmpi slt, %294, %295 : vector<8x1xi32>
    %cst_192 = arith.constant 0.000000e+00 : f32
    %297 = vector.shape_cast %296 : vector<8x1xi1> to vector<8x1xi1>
    %298 = vector.broadcast %297 : vector<8x1xi1> to vector<8x64xi1>
    %299 = vector.broadcast %cst_192 : f32 to vector<8x64xf32>
    %300 = arith.select %298, %277, %299 : vector<8x64xi1>, vector<8x64xf32>
    %301 = arith.truncf %300 : vector<8x64xf32> to vector<8x64xbf16>
    %c8_193 = arith.constant 8 : index
    %c0_194 = arith.constant 0 : index
    %302 = vector.load %arg8[%c8_193, %c0_194] : memref<40x64xbf16, #tpu.memory_space<vmem>>, vector<8x64xbf16>
    tpu.vector_store %arg8[%c8_193, %c0_194], %301 {strides = array<i32>} : memref<40x64xbf16, #tpu.memory_space<vmem>>, vector<8x64xbf16>,
    %c7_195 = arith.constant 7 : index
    %c0_196 = arith.constant 0 : index
    %303 = vector.load %arg8[%c7_195, %c0_196] : memref<40x64xbf16, #tpu.memory_space<vmem>>, vector<8x64xbf16>
    %c8_197 = arith.constant 8 : index
    %c0_198 = arith.constant 0 : index
    %304 = vector.load %arg8[%c8_197, %c0_198] : memref<40x64xbf16, #tpu.memory_space<vmem>>, vector<8x64xbf16>
    %c9_199 = arith.constant 9 : index
    %c0_200 = arith.constant 0 : index
    %305 = vector.load %arg8[%c9_199, %c0_200] : memref<40x64xbf16, #tpu.memory_space<vmem>>, vector<8x64xbf16>
    %306 = tpu.concatenate %303, %304, %305 in 1 : vector<8x64xbf16>, vector<8x64xbf16>, vector<8x64xbf16> -> vector<8x192xbf16>
    %c6 = arith.constant 6 : index
    %c0_201 = arith.constant 0 : index
    %c0_202 = arith.constant 0 : index
    %307 = vector.load %arg4[%c6, %c0_201, %c0_202] : memref<7x192x64xbf16, #tpu.memory_space<vmem>>, vector<1x192x64xbf16>
    %308 = vector.shape_cast %307 : vector<1x192x64xbf16> to vector<192x64xbf16>
    %cst_203 = arith.constant dense<0.000000e+00> : vector<8x64xf32>
    %309 = tpu.matmul %306, %308, %cst_203 {dimension_numbers = #tpu.dot_dimension_numbers<[1], [0], [0], [1], [0, 0, 1, 1], [], []>} : vector<8x192xbf16>, vector<192x64xbf16>, vector<8x64xf32> -> vector<8x64xf32>
    %c6_204 = arith.constant 6 : index
    %c0_205 = arith.constant 0 : index
    %c0_206 = arith.constant 0 : index
    %310 = vector.load %arg5[%c6_204, %c0_205, %c0_206] : memref<7x1x64xf32, #tpu.memory_space<vmem>>, vector<1x1x64xf32>
    %311 = vector.shape_cast %310 : vector<1x1x64xf32> to vector<1x64xf32>
    %312 = vector.broadcast %311 : vector<1x64xf32> to vector<8x64xf32>
    %313 = arith.addf %309, %312 : vector<8x64xf32>
    %cst_207 = arith.constant 0.000000e+00 : f32
    %314 = vector.broadcast %cst_207 : f32 to vector<8x64xf32>
    %315 = arith.maximumf %313, %314 : vector<8x64xf32>
    %c8_208 = arith.constant 8 : index
    %c0_209 = arith.constant 0 : index
    %316 = vector.load %arg7[%c8_208, %c0_209] : memref<40x64xf32, #tpu.memory_space<vmem>>, vector<8x64xf32>
    tpu.vector_store %arg7[%c8_208, %c0_209], %315 {strides = array<i32>} : memref<40x64xf32, #tpu.memory_space<vmem>>, vector<8x64xf32>,
    %c8_210 = arith.constant 8 : index
    %c0_211 = arith.constant 0 : index
    %317 = tpu.strided_load %arg7[%c8_210, %c0_211] {strides = array<i32: 2, 1>} : memref<40x64xf32, #tpu.memory_space<vmem>>, vector<4x64xf32>
    %c9_212 = arith.constant 9 : index
    %c0_213 = arith.constant 0 : index
    %318 = tpu.strided_load %arg7[%c9_212, %c0_213] {strides = array<i32: 2, 1>} : memref<40x64xf32, #tpu.memory_space<vmem>>, vector<4x64xf32>
    %319 = tpu.concatenate %317, %318 in 1 : vector<4x64xf32>, vector<4x64xf32> -> vector<4x128xf32>
    %320 = arith.truncf %319 : vector<4x128xf32> to vector<4x128xbf16>
    %c0_214 = arith.constant 0 : index
    %c0_215 = arith.constant 0 : index
    %c0_216 = arith.constant 0 : index
    %321 = vector.load %arg6[%c0_214, %c0_215, %c0_216] : memref<1x4x128xbf16, #tpu.memory_space<vmem>>, vector<1x4x128xbf16>
    %322 = vector.shape_cast %321 : vector<1x4x128xbf16> to vector<4x128xbf16>
    %323 = vector.shape_cast %320 : vector<4x128xbf16> to vector<1x4x128xbf16>
    tpu.vector_store %arg6[%c0_214, %c0_215, %c0_216], %323 {strides = array<i32>} : memref<1x4x128xbf16, #tpu.memory_space<vmem>>, vector<1x4x128xbf16>,
    return
  }
  func.func @transform_0(%arg0: i32) -> (i32, i32, i32) {
    %c0_i32 = arith.constant 0 : i32
    %c0_i32_0 = arith.constant 0 : i32
    %c0_i32_1 = arith.constant 0 : i32
    return %arg0, %c0_i32, %c0_i32_0 : i32, i32, i32
  }
  func.func @transform_1(%arg0: i32) -> (i32, i32) {
    %c0_i32 = arith.constant 0 : i32
    %c0_i32_0 = arith.constant 0 : i32
    %c0_i32_1 = arith.constant 0 : i32
    return %c0_i32, %c0_i32_0 : i32, i32
  }
  func.func @transform_2(%arg0: i32) -> (i32, i32) {
    %c0_i32 = arith.constant 0 : i32
    %c0_i32_0 = arith.constant 0 : i32
    %c0_i32_1 = arith.constant 0 : i32
    return %c0_i32, %c0_i32_0 : i32, i32
  }
  func.func @transform_3(%arg0: i32) -> (i32, i32, i32) {
    %c0_i32 = arith.constant 0 : i32
    %c0_i32_0 = arith.constant 0 : i32
    %c0_i32_1 = arith.constant 0 : i32
    %c0_i32_2 = arith.constant 0 : i32
    return %c0_i32, %c0_i32_0, %c0_i32_1 : i32, i32, i32
  }
  func.func @transform_4(%arg0: i32) -> (i32, i32, i32) {
    %c0_i32 = arith.constant 0 : i32
    %c0_i32_0 = arith.constant 0 : i32
    %c0_i32_1 = arith.constant 0 : i32
    %c0_i32_2 = arith.constant 0 : i32
    return %c0_i32, %c0_i32_0, %c0_i32_1 : i32, i32, i32
  }
  func.func @transform_5(%arg0: i32) -> (i32, i32, i32) {
    %c0_i32 = arith.constant 0 : i32
    %c0_i32_0 = arith.constant 0 : i32
    %c0_i32_1 = arith.constant 0 : i32
    return %arg0, %c0_i32, %c0_i32_0 : i32, i32, i32
  }
}

</mosaic_0001>

<bundles_post_ra>
// kernel: feature_extraction.1
= control target key start
LH: loop header
LB: loop body
LE: loop exit
PB: predicated region body
PF: predicated region fallthrough
CT: control target
= control target key end

     0   :  { %s2512_s18 = smov 0   ;;  %s2908_s0 = inlined_call_operand.vmem [shape: bf16[2,32,9], index: 0, kind: input, shape index: {}]   ;;  %s2909_s1 = inlined_call_operand.vmem [shape: bf16[9,64], index: 1, kind: input, shape index: {}]   ;;  %s2910_s2 = inlined_call_operand.vmem [shape: f32[1,64], index: 2, kind: input, shape index: {}]   ;;  %s2911_s3 = inlined_call_operand.vmem [shape: bf16[7,192,64], index: 3, kind: input, shape index: {}]   ;;  %s2912_s4 = inlined_call_operand.vmem [shape: f32[7,1,64], index: 4, kind: input, shape index: {}]   ;;  %s2913_s5 = inlined_call_operand.vmem [shape: bf16[2,4,128], index: 5, kind: output, shape index: {}]  }
   0x1 LB: > { %s1834_s19 = sadd.s32 4294967295, %s2476_s18   ;;  %p1838_p0 = scmp.ge.s32.totalorder %s2476_s18, 1  ;;  %s2476_s18 = sphi %s2512_s18, %s15_s18  }
   0x2   : > { %p187_p1 = scmp.lt.s32.totalorder %s2476_s18, 3 }
   0x4   : > { %p188_p2 = pnand %p1838_p0, %p187_p1 }
   0x5   : > { %p214_p3 = scmp.lt.s32.totalorder (!%p188_p2), %s1834_s19, 1  ;;  %s2481_s23 = smov (!%p188_p2), 64  }
   0x6   : > { %191 = sbr.rel (%p188_p2) target bundleno = 2247 (0x8c7), region = 40 }
   0xb   : > { %v1852_v0 = vld [vmem:[%s2909_s1] sm:$0xf]  ;;  %v2355_v1 = vld [vmem:[%s2909_s1] sm:$0x10]  ;;  %vm261_vm0 = vcmask 1043456   ;;  %vm262_vm1 = vcmask 1044480   ;;  %v307_v15 = vlaneseq }
   0xc   : > { %v1853_v2 = vor.u32 %v2355_v1, %v1852_v0  ;;  %v2478_v3 = vmov 65535   ;;  %s2917_s19 = smov (!%p214_p3, %s1834_s19), 1  ;;  %vm254_vm2 = vcmask 72704   ;;  %vm224_vm3 = vcmask 523264   ;;  %v2457_v11 = vld [vmem:[%s2910_s2] ss:$0 sm:$0xff] }
   0xd   : > { %v263_v4 = vsel %vm261_vm0, 4294967295, %v2478_v3  ;;  %s2352_s24 = sshll.u32 %s2917_s19, 4  ;;  %v2479_v9 = vmov 0.0   ;;  %vm226_vm4 = vcmask 519168   ;;  %v2480_v10 = vmov 0   ;;  %v2367_v20 = vld [vmem:[%s2911_s3 + $0x58] sm:$0xff] }
   0xe   : > { %v264_v5 = vsel %vm262_vm1, %v263_v4, 0  ;;  %s218_s27 = scalar_lea.vmem %s2908_s0, %s2352_s24  ;;  %225 = vst.msk [vmem:[#allocation2] sm:$0xff] %vm224_vm3, %v2479_v9  ;;  %v2545_v18 = vshrl.u32 %v307_v15, 7  ;;  %566 = vmatpush.bf16.msra.mxu2 %v2367_v20  ;;  %v2366_v21 = vld [vmem:[%s2911_s3 + $0x50] sm:$0xff]  ;;  %v2365_v25 = vld [vmem:[%s2911_s3 + $0x48] sm:$0xff]  ;;  %v2364_v37 = vld [vmem:[%s2911_s3 + $0x40] sm:$0xff] }
   0xf   : > { %v266_v6 = vand.u32 %v1853_v2, %v264_v5  ;;  %v2353_v7 = vld [vmem:[%s218_s27] sm:$0xff]  ;;  %v2354_v8 = vld [vmem:[%s218_s27 + $0x8] sm:$0xff]  ;;  %350 = vst.msk [vmem:[#allocation3 + $0xc] sm:$0xf] %vm226_vm4, %v2480_v10  ;;  %vm860_vm6 = vcmask 519170   ;;  %v2363_v47 = vld [vmem:[%s2911_s3 + $0x38] sm:$0xff] }
  0x10   : > { %227 = vst.msk [vmem:[#allocation3] sm:$0xf] %vm226_vm4, %v2480_v10  ;;  %v314_v22 = vand.u32 15, %v2545_v18  ;;  %v355_v45 = vld [vmem:[#allocation3 + $0x10] sm:$0x1]  ;;  %544 = vmatpush.bf16.msra.mxu1 %v2363_v47  ;;  %v2362_v52 = vld [vmem:[%s2911_s3 + $0x30] sm:$0xff] }
  0x11   : > { %275 = vmatpush.bf16.msra.mxu0 %v266_v6  ;;  %228 = vst.msk [vmem:[#allocation4] sm:$0xf] %vm226_vm4, %v2480_v10  ;;  %v391_v46 = vunpack.c.l.b16 %v355_v45  ;;  %vm393_vm7 = vcmask 1042432   ;;  %v2361_v60 = vld [vmem:[%s2911_s3 + $0x28] sm:$0xff]  ;;  %v2360_v9 = vld [vmem:[%s2911_s3 + $0x20] sm:$0xff]  ;;  %v592_v47 = vand.u32 65535, %v2545_v18 }
  0x12   : > { %631 = vst.msk [vmem:[#allocation4 + $0x8] sm:$0xf] %vm226_vm4, %v2480_v10  ;;  %567 = vmatpush.bf16.msra.mxu2 %v2366_v21  ;;  %vm334_vm5 = vcmp.eq.s32.totalorder %v314_v22, 0  ;;  %vm431_vm8 = vsmask.f32 4352  ;;  %v2359_v21 = vld [vmem:[%s2911_s3 + $0x18] sm:$0xff] }
  0x13   : > { %vm368_vm9 = vsmask.f32 3328  ;;  %v2358_v22 = vld [vmem:[%s2911_s3 + $0x10] sm:$0xff]  ;;  %vm1061_vm0 = vcmask 519169   ;;  %s1841_s11 = sshll.u32 %s2917_s19, 1 }
  0x14   : > { %1854 = vmatmul.msk.bf16.vlgmr.msra.gmra.mxu0 %vm254_vm2, %v2353_v7  ;;  %545 = vmatpush.bf16.msra.mxu1 %v2362_v52  ;;  %s222_s14 = scalar_lea.vmem %s2913_s5, %s1841_s11 }
  0x16   : > { %568 = vmatpush.bf16.msra.mxu2 %v2365_v25 }
  0x17   : > { %v351_v25 = vld [vmem:[#allocation3] sm:$0x8] }
  0x18   : > { %546 = vmatpush.bf16.msra.mxu1 %v2361_v60 }
  0x1a   : > { %569 = vmatpush.bf16.msra.mxu2 %v2364_v37 }
  0x1c   : > { %547 = vmatpush.bf16.msra.mxu1 %v2360_v9 }
  0x20   : > { %548 = vmatpush.bf16.msra.mxu1 %v2359_v21 }
  0x24   : > { %1855 = vmatmul.msk.bf16.gmra.mxu0 %vm254_vm2, %v2354_v8  ;;  %549 = vmatpush.bf16.msra.mxu1 %v2358_v22  ;;  %vm858_vm2 = vcmask 517120  }
  0x91   : > { %v277_v12 = vpop.f32.mrf.mxu0 }
  0x92   : > { %v278_v13 = vadd.f32 %v2457_v11, %v277_v12 }
  0x94   : > { %v287_v14 = vmax.f32 %v278_v13, 0.0 }
  0x96   : > { %291 = vst.msk [vmem:[#allocation2 + $0x8] sm:$0xff] %vm224_vm3, %v287_v14 }
  0x99   : > { %v279_v16 = vpop.f32.mrf.mxu0 }
  0x9a   : > { %v280_v17 = vadd.f32 %v2457_v11, %v279_v16 }
  0x9c   : > { %v288_v19 = vmax.f32 %v280_v17, 0.0 }
  0x9e   : > { %292 = vst.msk [vmem:[#allocation2 + $0x10] sm:$0xff] %vm224_vm3, %v288_v19 }
  0xa1   : > { %v282_v23 = vpop.f32.mrf.mxu0 }
  0xa2   : > { %v283_v24 = vadd.f32 %v2457_v11, %v282_v23  ;;  %v2357_v23 = vld [vmem:[%s2911_s3 + $0x8] sm:$0xff] }
  0xa3   : > { %550 = vmatpush.bf16.msra.mxu1 %v2357_v23  ;;  %v2375_v23 = vld [vmem:[%s2911_s3 + $0x98] sm:$0xff] }
  0xa4   : > { %v289_v26 = vmax.f32 %v283_v24, 0.0  ;;  %v2356_v24 = vld [vmem:[%s2911_s3] sm:$0xff]  ;;  %804 = vmatpush.bf16.msra.mxu3 %v2375_v23 }
  0xa5   : > { %v296_v27 = vld [vmem:[#allocation2 + $0x7] ss:$2 sm:$0xff]  ;;  %v300_v28 = vld [vmem:[#allocation2 + $0x8] ss:$2 sm:$0xff]  ;;  %v2459_v23 = vld [vmem:[%s2912_s4 + $0x1] ss:$0 sm:$0xff] }
  0xa6   : > { %v304_v29 = vld [vmem:[#allocation2 + $0x9] ss:$2 sm:$0xff]  ;;  %293 = vst.msk [vmem:[#allocation2 + $0x18] sm:$0xff] %vm224_vm3, %v289_v26  ;;  %v340_v30 = vsel %vm334_vm5, 0.0, %v296_v27  ;;  %v360_v26 = vunpack.c.l.b16 %v351_v25 }
  0xa7   : > { %v342_v31 = vmax.f32 %v300_v28, %v304_v29  ;;  %551 = vmatpush.bf16.msra.mxu1 %v2356_v24  ;;  %v2374_v25 = vld [vmem:[%s2911_s3 + $0x90] sm:$0xff] }
  0xa8   : > { %805 = vmatpush.bf16.msra.mxu3 %v2374_v25 }
  0xa9   : > { %v344_v32 = vmax.f32 %v342_v31, %v340_v30  ;;  %v284_v33 = vpop.f32.mrf.mxu0 }
  0xaa   : > { %v285_v34 = vadd.f32 %v2457_v11, %v284_v33 }
  0xab   : > { %v346_v35 = vpack.c.bf16 %v344_v32, %v344_v32 }
  0xac   : > { %v290_v36 = vmax.f32 %v285_v34, 0.0 }
  0xad   : > { %348 = vst.msk [vmem:[#allocation3 + $0x4] sm:$0xf] %vm226_vm4, %v346_v35 }
  0xae   : > { %294 = vst.msk [vmem:[#allocation2 + $0x20] sm:$0xff] %vm224_vm3, %v290_v36 }
  0xb4   : > { %v2564_v38 = vld [vmem:[#allocation3 + $0x4] sm:$0xf] }
  0xb5   : > { %861 = vst.msk [vmem:[#allocation3 + $0x4] sm:$0xc] %vm860_vm6, %v2480_v10  ;;  %v302_v39 = vld [vmem:[#allocation2 + $0x18] ss:$2 sm:$0xff]  ;;  %v306_v40 = vld [vmem:[#allocation2 + $0x19] ss:$2 sm:$0xff]  ;;  %v361_v51 = vunpack.c.l.b16 %v2564_v38 }
  0xb6   : > { %v343_v41 = vmax.f32 %v302_v39, %v306_v40  ;;  %v298_v42 = vld [vmem:[#allocation2 + $0x17] ss:$2 sm:$0xff]  ;;  %vm1059_vm6 = vcmask 516096  }
  0xb7   : > { %v364_v28 = vpack.c.b16 %v361_v51, %v360_v26 }
  0xb8   : > { %v345_v43 = vmax.f32 %v343_v41, %v298_v42 }
  0xba   : > { %v347_v44 = vpack.c.bf16 %v345_v43, %v345_v43 }
  0xbc   : > { %349 = vst.msk [vmem:[#allocation3 + $0x8] sm:$0xf] %vm226_vm4, %v347_v44 }
  0xc3   : > { %v2571_v48 = vld [vmem:[#allocation3 + $0x8] sm:$0xff]  }
  0xc4   : > { %v2442_v49 = vunpack.c.l.b16 %v2571_v48  ;;  %v2443_v50 = vunpack.c.h.b16 %v2571_v48 }
  0xc6   : > { %v366_v53 = vpack.c.b16 %v2442_v49, %v361_v51  ;;  %v392_v54 = vpack.c.b16 %v391_v46, %v2443_v50  ;;  %v367_v55 = vpack.c.b16 %v2443_v50, %v2443_v50  ;;  %v596_v49 = vmul.u32 43690, %v592_v47 }
  0xc7   : > { %v595_v50 = vmul.u32 43691, %v592_v47 }
  0xc8   : > { %v370_v56 = vshrl.u32 %v366_v53, 16  ;;  %v373_v57 = vshll.u32 %v366_v53, 16  ;;  %v394_v58 = vrot.slane %v366_v53, 5  ;;  %v395_v59 = vrot.slane %v392_v54, 5 }
  0xc9   : > { %v378_v61 = vshrl.u32 %v367_v55, 16  ;;  %v381_v62 = vshll.u32 %v367_v55, 16  ;;  %v599_v52 = vshll.u32 %v596_v49, 16 }
  0xca   : > { %v372_v63 = vrot.slane %v370_v56, 4  ;;  %v375_v0 = vrot.slane %v373_v57, 5  ;;  %v396_v1 = vsel %vm393_vm7, %v394_v58, %v395_v59  ;;  %v448_v2 = vshrl.u32 %v394_v58, 16 }
  0xcb   : > { %v451_v3 = vshll.u32 %v394_v58, 16  ;;  %v456_v4 = vshrl.u32 %v396_v1, 16  ;;  %v459_v5 = vshll.u32 %v396_v1, 16  ;;  %v380_v8 = vrot.slane %v378_v61, 4 }
  0xcc   : > { %v376_v6 = vor.u32 %v375_v0, %v372_v63  ;;  %v450_v7 = vrot.slane %v448_v2, 3  ;;  %v383_v14 = vrot.slane %v381_v62, 5  ;;  %vm603_vm10 = vc.u32 %v595_v50, %v599_v52  ;;  %v2379_v63 = vld [vmem:[%s2911_s3 + $0xb8] sm:$0xff]  ;;  %v2378_v0 = vld [vmem:[%s2911_s3 + $0xb0] sm:$0xff]  ;;  %v2458_v2 = vld [vmem:[%s2912_s4] ss:$0 sm:$0xff] }
  0xcd   : > { %v453_v11 = vrot.slane %v451_v3, 4  ;;  %v458_v12 = vrot.slane %v456_v4, 3  ;;  %v461_v13 = vrot.slane %v459_v5, 4  ;;  %v605_v54 = vadd.s32 %v599_v52, %v595_v50  ;;  %822 = vmatpush.bf16.msrb.mxu0 %v2379_v63  ;;  %v2377_v3 = vld [vmem:[%s2911_s3 + $0xa8] sm:$0xff]  ;;  %v2368_v63 = vld [vmem:[%s2911_s3 + $0x60] sm:$0xff] }
  0xce   : > { %386 = vrot.lane.b32.xlu0 %v376_v6, %s2481_s23  ;;  %v384_v19 = vor.u32 %v383_v14, %v380_v8  ;;  %v604_v56 = vsel %vm603_vm10, 1, %v2480_v10  ;;  %v600_v59 = vshrl.u32 %v596_v49, 16 }
  0xcf   : > { %v454_v15 = vor.u32 %v453_v11, %v450_v7  ;;  %v462_v16 = vor.u32 %v461_v13, %v458_v12 }
  0xd0   : > { %v385_v20 = vsel %vm368_vm9, %v376_v6, %v384_v19 }
  0xd1   : > { %v463_v17 = vsel %vm431_vm8, %v454_v15, %v462_v16  ;;  %823 = vmatpush.bf16.msrb.mxu0 %v2378_v0  ;;  %v2467_v0 = vld [vmem:[#allocation4] sm:$0x8] }
  0xd2   : > { %1904 = vmatmul.msk.bf16.vlgmr.msra.gmra.mxu2 %vm224_vm3, %v463_v17  ;;  %v2376_v17 = vld [vmem:[%s2911_s3 + $0xa0] sm:$0xff] }
  0xd5   : > { %824 = vmatpush.bf16.msrb.mxu0 %v2377_v3 }
  0xd6   : > { %388 = vrot.lane.b32.xlu0 %v385_v20, %s2481_s23 }
  0xd9   : > { %825 = vmatpush.bf16.msrb.mxu0 %v2376_v17 }
  0xe2   : > { %1905 = vmatmul.msk.bf16.gmra.mxu2 %vm224_vm3, %v462_v16 }
 0x140   : > { %v387_v27 = vpop.permute.xlu0 %386 }
 0x141   : > { %v399_v29 = vsel %vm224_vm3, %v364_v28, %v387_v27 }
 0x142   : > { %v432_v30 = vshrl.u32 %v399_v29, 16  ;;  %v435_v31 = vshll.u32 %v399_v29, 16 }
 0x144   : > { %v434_v34 = vrot.slane %v432_v30, 3  ;;  %v437_v35 = vrot.slane %v435_v31, 4 }
 0x146   : > { %v438_v40 = vor.u32 %v437_v35, %v434_v34  ;;  %v635_v35 = vld [vmem:[#allocation4 + $0xc] sm:$0x1] }
 0x148   : > { %v389_v32 = vpop.permute.xlu0 %388 }
 0x149   : > { %v402_v33 = vsel %vm224_vm3, %v2571_v48, %v389_v32  ;;  %v593_v48 = vshrl.u32 %v2545_v18, 16 }
 0x14a   : > { %v439_v36 = vshrl.u32 %v402_v33, 16  ;;  %v442_v37 = vshll.u32 %v402_v33, 16  ;;  %v2373_v33 = vld [vmem:[%s2911_s3 + $0x88] sm:$0xff] }
 0x14b   : > { %v597_v51 = vmul.u32 43691, %v593_v48  ;;  %v598_v55 = vmul.u32 43690, %v593_v48  ;;  %806 = vmatpush.bf16.msra.mxu3 %v2373_v33 }
 0x14c   : > { %v441_v38 = vrot.slane %v439_v36, 3  ;;  %v444_v39 = vrot.slane %v442_v37, 4  ;;  %v2372_v36 = vld [vmem:[%s2911_s3 + $0x80] sm:$0xff]  ;;  %v656_v37 = vunpack.c.l.b16 %v635_v35  ;;  %v2387_v35 = vld [vmem:[%s2911_s3 + $0xf8] sm:$0xff] }
 0x14d   : > { %v601_v53 = vshll.u32 %v597_v51, 16  ;;  %v606_v57 = vadd.s32 %v604_v56, %v598_v55  ;;  %v602_v61 = vshrl.u32 %v597_v51, 16  ;;  %1009 = vmatpush.bf16.msrb.mxu2 %v2387_v35  ;;  %v2397_v35 = vld [vmem:[%s2911_s3 + $0x148] sm:$0xff] }
 0x14e   : > { %v445_v41 = vor.u32 %v444_v39, %v441_v38  ;;  %v2371_v38 = vld [vmem:[%s2911_s3 + $0x78] sm:$0xff]  ;;  %v657_v39 = vpack.c.b16 %v656_v37, %v656_v37 }
 0x14f   : > { %vm607_vm11 = vc.u32 %v605_v54, %v601_v53  ;;  %807 = vmatpush.bf16.msra.mxu3 %v2372_v36  ;;  %v2386_v36 = vld [vmem:[%s2911_s3 + $0xf0] sm:$0xff] }
 0x150   : > { %v446_v42 = vsel %vm431_vm8, %v438_v40, %v445_v41  ;;  %v608_v58 = vsel %vm607_vm11, 1, %v2480_v10 }
 0x151   : > { %552 = vmatmul.bf16.vlgmr.msra.gmra.mxu1 %v446_v42  ;;  %v610_v60 = vadd.s32 %v608_v58, %v606_v57  ;;  %1010 = vmatpush.bf16.msrb.mxu2 %v2386_v36 }
 0x153   : > { %v611_v62 = vadd.s32 %v610_v60, %v600_v59  ;;  %808 = vmatpush.bf16.msra.mxu3 %v2371_v38 }
 0x155   : > { %v571_v43 = vpop.f32.mrf.mxu2  ;;  %v612_v1 = vadd.s32 %v611_v62, %v602_v61  ;;  %v2369_v62 = vld [vmem:[%s2911_s3 + $0x68] sm:$0xff] }
 0x157   : > { %v613_v4 = vshrl.u32 %v612_v1, 3 }
 0x159   : > { %v614_v8 = vmul.u32 12, %v613_v4 }
 0x15b   : > { %v615_v11 = vsub.s32 %v2545_v18, %v614_v8 }
 0x15d   : > { %v573_v44 = vpop.f32.mrf.mxu2  ;;  %vm618_vm12 = vcmp.ne.s32.totalorder %v615_v11, 0  ;;  %vm619_vm13 = vcmp.lt.s32.totalorder %v615_v11, 0  ;;  %v621_v16 = vadd.s32 12, %v615_v11 }
 0x15e   : > { %vm620_vm14 = vmand %vm619_vm13, %vm618_vm12 }
 0x15f   : > { %v622_v21 = vsel %vm620_vm14, %v621_v16, %v615_v11 }
 0x160   : > { %vm623_vm15 = vcmp.eq.s32.totalorder %v622_v21, 0  ;;  %v2389_v21 = vld [vmem:[%s2911_s3 + $0x108] sm:$0xff] }
 0x161   : > { %557 = vmatmul.bf16.gmra.mxu1 %v445_v41 }
 0x165   : > { %v576_v45 = vpop.f32.mrf.mxu2 }
 0x16d   : > { %v578_v46 = vpop.f32.mrf.mxu2 }
 0x1ce   : > { %v553_v5 = vpop.f32.mrf.mxu1 }
 0x1cf   : > { %v554_v6 = vadd.f32 %v2458_v2, %v553_v5 }
 0x1d1   : > { %v572_v7 = vadd.f32 %v571_v43, %v554_v6  ;;  %v2370_v43 = vld [vmem:[%s2911_s3 + $0x70] sm:$0xff] }
 0x1d2   : > { %809 = vmatpush.bf16.msra.mxu3 %v2370_v43 }
 0x1d3   : > { %v580_v9 = vmax.f32 %v572_v7, 0.0 }
 0x1d5   : > { %583 = vst.msk [vmem:[#allocation2 + $0x8] sm:$0xff] %vm224_vm3, %v580_v9 }
 0x1d6   : > { %v555_v12 = vpop.f32.mrf.mxu1  ;;  %810 = vmatpush.bf16.msra.mxu3 %v2369_v62 }
 0x1d7   : > { %v556_v13 = vadd.f32 %v2458_v2, %v555_v12 }
 0x1d9   : > { %v574_v14 = vadd.f32 %v573_v44, %v556_v13  ;;  %v659_v44 = vrot.slane %v657_v39, 5 }
 0x1da   : > { %811 = vmatpush.bf16.msra.mxu3 %v2368_v63 }
 0x1db   : > { %v581_v15 = vmax.f32 %v574_v14, 0.0 }
 0x1dd   : > { %584 = vst.msk [vmem:[#allocation2 + $0x10] sm:$0xff] %vm224_vm3, %v581_v15 }
 0x1de   : > { %v558_v19 = vpop.f32.mrf.mxu1 }
 0x1df   : > { %v559_v20 = vadd.f32 %v2458_v2, %v558_v19  ;;  %v2391_v19 = vld [vmem:[%s2911_s3 + $0x118] sm:$0xff] }
 0x1e0   : > { %1026 = vmatpush.bf16.msrb.mxu3 %v2391_v19  ;;  %v2400_v19 = vld [vmem:[%s2911_s3 + $0x160] sm:$0xff] }
 0x1e1   : > { %v577_v22 = vadd.f32 %v576_v45, %v559_v20  ;;  %v2390_v20 = vld [vmem:[%s2911_s3 + $0x110] sm:$0xff] }
 0x1e3   : > { %v582_v24 = vmax.f32 %v577_v22, 0.0  ;;  %v2388_v22 = vld [vmem:[%s2911_s3 + $0x100] sm:$0xff] }
 0x1e4   : > { %v586_v26 = vld [vmem:[#allocation2 + $0x7] ss:$2 sm:$0xff]  ;;  %v587_v27 = vld [vmem:[#allocation2 + $0x8] ss:$2 sm:$0xff]  ;;  %1027 = vmatpush.bf16.msrb.mxu3 %v2390_v20  ;;  %v2460_v20 = vld [vmem:[%s2912_s4 + $0x2] ss:$0 sm:$0xff] }
 0x1e5   : > { %v588_v28 = vld [vmem:[#allocation2 + $0x9] ss:$2 sm:$0xff]  ;;  %585 = vst.msk [vmem:[#allocation2 + $0x18] sm:$0xff] %vm224_vm3, %v582_v24  ;;  %v626_v29 = vsel %vm623_vm15, 0.0, %v586_v26 }
 0x1e6   : > { %v627_v30 = vmax.f32 %v587_v27, %v588_v28  ;;  %v560_v31 = vpop.f32.mrf.mxu1 }
 0x1e8   : > { %v628_v32 = vmax.f32 %v627_v30, %v626_v29  ;;  %1028 = vmatpush.bf16.msrb.mxu3 %v2389_v21 }
 0x1ea   : > { %v629_v34 = vpack.c.bf16 %v628_v32, %v628_v32 }
 0x1ec   : > { %630 = vst.msk [vmem:[#allocation4 + $0x4] sm:$0xf] %vm226_vm4, %v629_v34  ;;  %1029 = vmatpush.bf16.msrb.mxu3 %v2388_v22  ;;  %v843_v34 = vand.u32 7, %v2545_v18 }
 0x1ee   : > { %vm851_vm1 = vcmp.eq.s32.totalorder %v843_v34, 0 }
 0x1f3   : > { %v633_v40 = vld [vmem:[#allocation4 + $0x4] sm:$0xff]  }
 0x1f4   : > { %v2473_v41 = vld [vmem:[#allocation4] sm:$0xf0]   ;;  %v641_v42 = vunpack.c.h.b16 %v633_v40  ;;  %v646_v45 = vshrl.u32 %v633_v40, 16  ;;  %v649_v46 = vshll.u32 %v633_v40, 16  ;;  %v658_v47 = vrot.slane %v633_v40, 5 }
 0x1f5   : > { %1062 = vst.msk [vmem:[#allocation4 + $0x4] sm:$0xe] %vm1061_vm0, %v2480_v10  ;;  %v2468_v2 = vor.u32 %v2473_v41, %v2467_v0 }
 0x1f6   : > { %v648_v48 = vrot.slane %v646_v45, 4  ;;  %v651_v49 = vrot.slane %v649_v46, 5  ;;  %v660_v50 = vsel %vm393_vm7, %v658_v47, %v659_v44  ;;  %v712_v51 = vshrl.u32 %v658_v47, 16  ;;  %v2384_v45 = vld [vmem:[%s2911_s3 + $0xe0] sm:$0xff]  ;;  %v2383_v46 = vld [vmem:[%s2911_s3 + $0xd8] sm:$0xff] }
 0x1f7   : > { %v715_v52 = vshll.u32 %v658_v47, 16  ;;  %v720_v53 = vshrl.u32 %v660_v50, 16  ;;  %v723_v54 = vshll.u32 %v660_v50, 16  ;;  %v643_v1 = vpack.c.b16 %v641_v42, %v641_v42  ;;  %v2385_v42 = vld [vmem:[%s2911_s3 + $0xe8] sm:$0xff]  ;;  %v864_v47 = vld [vmem:[#allocation3 + $0x8] sm:$0x1] }
 0x1f8   : > { %v652_v55 = vor.u32 %v651_v49, %v648_v48  ;;  %v714_v10 = vrot.slane %v712_v51, 3  ;;  %1011 = vmatpush.bf16.msrb.mxu2 %v2385_v42  ;;  %v2382_v48 = vld [vmem:[%s2911_s3 + $0xd0] sm:$0xff]  ;;  %v882_v51 = vunpack.c.l.b16 %v864_v47  ;;  %v2393_v47 = vld [vmem:[%s2911_s3 + $0x128] sm:$0xff]  ;;  %vm2777_vm7 = vcmp.lt.s32.totalorder %v843_v34, 2  ;;  %v2407_v34 = vld [vmem:[%s2911_s3 + $0x198] sm:$0xff] }
 0x1f9   : > { %v717_v56 = vrot.slane %v715_v52, 4  ;;  %v722_v57 = vrot.slane %v720_v53, 3  ;;  %v725_v58 = vrot.slane %v723_v54, 4  ;;  %v2381_v54 = vld [vmem:[%s2911_s3 + $0xc8] sm:$0xff]  ;;  %v2394_v42 = vld [vmem:[%s2911_s3 + $0x130] sm:$0xff] }
 0x1fa   : > { %653 = vrot.lane.b32.xlu1 %v652_v55, %s2481_s23 }
 0x1fb   : > { %v718_v59 = vor.u32 %v717_v56, %v714_v10  ;;  %v726_v60 = vor.u32 %v725_v58, %v722_v57 }
 0x1fc   : > { %1012 = vmatpush.bf16.msrb.mxu2 %v2384_v45 }
 0x1fd   : > { %v727_v61 = vsel %vm431_vm8, %v718_v59, %v726_v60 }
 0x1fe   : > { %1979 = vmatmul.msk.bf16.vlgmr.msrb.gmra.mxu0 %vm224_vm3, %v727_v61 }
 0x200   : > { %1013 = vmatpush.bf16.msrb.mxu2 %v2383_v46 }
 0x204   : > { %1014 = vmatpush.bf16.msrb.mxu2 %v2382_v48 }
 0x208   : > { %1015 = vmatpush.bf16.msrb.mxu2 %v2381_v54 }
 0x26c   : > { %v654_v3 = vpop.permute.xlu1 %653 }
 0x26d   : > { %v663_v4 = vsel %vm224_vm3, %v2468_v2, %v654_v3  ;;  %v665_v5 = vsel %vm224_vm3, %v643_v1, %v654_v3  ;;  %v2380_v1 = vld [vmem:[%s2911_s3 + $0xc0] sm:$0xff]  ;;  %v862_v2 = vld [vmem:[#allocation3] sm:$0x8] }
 0x26e   : > { %v696_v6 = vshrl.u32 %v663_v4, 16  ;;  %v699_v7 = vshll.u32 %v663_v4, 16  ;;  %v703_v8 = vshrl.u32 %v665_v5, 16  ;;  %v706_v9 = vshll.u32 %v665_v5, 16  ;;  %1016 = vmatpush.bf16.msrb.mxu2 %v2380_v1 }
 0x26f   : > { %v867_v3 = vunpack.c.l.b16 %v862_v2 }
 0x270   : > { %v698_v11 = vrot.slane %v696_v6, 3  ;;  %v701_v12 = vrot.slane %v699_v7, 4  ;;  %v705_v13 = vrot.slane %v703_v8, 3  ;;  %v708_v14 = vrot.slane %v706_v9, 4 }
 0x272   : > { %v702_v15 = vor.u32 %v701_v12, %v698_v11  ;;  %v709_v16 = vor.u32 %v708_v14, %v705_v13 }
 0x274   : > { %v710_v17 = vsel %vm431_vm8, %v702_v15, %v709_v16  ;;  %v2403_v15 = vld [vmem:[%s2911_s3 + $0x178] sm:$0xff]  ;;  %v2402_v16 = vld [vmem:[%s2911_s3 + $0x170] sm:$0xff] }
 0x275   : > { %812 = vmatmul.bf16.vlgmr.msra.gmra.mxu3 %v710_v17  ;;  %1227 = vmatpush.bf16.msra.mxu0 %v2403_v15  ;;  %v2401_v17 = vld [vmem:[%s2911_s3 + $0x168] sm:$0xff]  ;;  %v2410_v15 = vld [vmem:[%s2911_s3 + $0x1b0] sm:$0xff] }
 0x279   : > { %1228 = vmatpush.bf16.msra.mxu0 %v2402_v16 }
 0x27b   : > { %v827_v24 = vpop.f32.mrf.mxu0 }
 0x27d   : > { %1229 = vmatpush.bf16.msra.mxu0 %v2401_v17 }
 0x281   : > { %1230 = vmatpush.bf16.msra.mxu0 %v2400_v19  ;;  %v2430_v19 = vld [vmem:[%s2911_s3 + $0x250] sm:$0xff] }
 0x283   : > { %v829_v31 = vpop.f32.mrf.mxu0 }
 0x2f8   : > { %v813_v25 = vpop.f32.mrf.mxu3 }
 0x2f9   : > { %v814_v26 = vadd.f32 %v2459_v23, %v813_v25 }
 0x2fb   : > { %v828_v27 = vadd.f32 %v827_v24, %v814_v26  ;;  %v1044_v26 = vand.u32 3, %v2545_v18  ;;  %v2408_v18 = vld [vmem:[%s2911_s3 + $0x1a0] sm:$0xff] }
 0x2fd   : > { %v832_v28 = vmax.f32 %v828_v27, 0.0  ;;  %v2399_v27 = vld [vmem:[%s2911_s3 + $0x158] sm:$0xff]  ;;  %vm1052_vm5 = vcmp.eq.s32.totalorder %v1044_v26, 0  ;;  %v2406_v26 = vld [vmem:[%s2911_s3 + $0x190] sm:$0xff] }
 0x2fe   : > { %1210 = vmatpush.bf16.msrb.mxu1 %v2399_v27 }
 0x2ff   : > { %834 = vst.msk [vmem:[#allocation2 + $0x8] sm:$0xff] %vm224_vm3, %v832_v28  ;;  %v2398_v28 = vld [vmem:[%s2911_s3 + $0x150] sm:$0xff] }
 0x300   : > { %v815_v29 = vpop.f32.mrf.mxu3 }
 0x301   : > { %v816_v30 = vadd.f32 %v2459_v23, %v815_v29 }
 0x302   : > { %1211 = vmatpush.bf16.msrb.mxu1 %v2398_v28 }
 0x303   : > { %v830_v32 = vadd.f32 %v829_v31, %v816_v30 }
 0x305   : > { %v833_v33 = vmax.f32 %v830_v32, 0.0 }
 0x306   : > { %1212 = vmatpush.bf16.msrb.mxu1 %v2397_v35 }
 0x307   : > { %835 = vst.msk [vmem:[#allocation2 + $0x10] sm:$0xff] %vm224_vm3, %v833_v33 }
 0x30e   : > { %v836_v37 = vld [vmem:[#allocation2 + $0x7] ss:$2 sm:$0xff]  ;;  %v837_v38 = vld [vmem:[#allocation2 + $0x8] ss:$2 sm:$0xff] }
 0x30f   : > { %v838_v39 = vld [vmem:[#allocation2 + $0x9] ss:$2 sm:$0xff]  ;;  %v854_v40 = vsel %vm851_vm1, 0.0, %v836_v37 }
 0x310   : > { %v855_v41 = vmax.f32 %v837_v38, %v838_v39  ;;  %v2396_v38 = vld [vmem:[%s2911_s3 + $0x140] sm:$0xff]  ;;  %v2395_v39 = vld [vmem:[%s2911_s3 + $0x138] sm:$0xff] }
 0x311   : > { %1213 = vmatpush.bf16.msrb.mxu1 %v2396_v38 }
 0x312   : > { %v856_v43 = vmax.f32 %v855_v41, %v854_v40  ;;  %v1065_v40 = vld [vmem:[#allocation4 + $0x8] sm:$0x1] }
 0x313   : > { %v1083_v41 = vunpack.c.l.b16 %v1065_v40 }
 0x314   : > { %v857_v44 = vpack.c.bf16 %v856_v43, %v856_v43 }
 0x315   : > { %1214 = vmatpush.bf16.msrb.mxu1 %v2395_v39 }
 0x316   : > { %859 = vst.msk [vmem:[#allocation3 + $0x4] sm:$0x3] %vm858_vm2, %v857_v44 }
 0x319   : > { %1215 = vmatpush.bf16.msrb.mxu1 %v2394_v42 }
 0x31d   : > { %v863_v49 = vld [vmem:[#allocation3 + $0x4] sm:$0xf]  ;;  %1216 = vmatpush.bf16.msrb.mxu1 %v2393_v47 }
 0x31e   : > { %v868_v50 = vunpack.c.l.b16 %v863_v49 }
 0x320   : > { %v870_v52 = vpack.c.b16 %v868_v50, %v868_v50  ;;  %v883_v53 = vpack.c.b16 %v882_v51, %v868_v50  ;;  %v869_v4 = vpack.c.b16 %v868_v50, %v867_v3 }
 0x322   : > { %v872_v55 = vshrl.u32 %v870_v52, 16  ;;  %v875_v10 = vshll.u32 %v870_v52, 16  ;;  %v884_v56 = vrot.slane %v883_v53, 5 }
 0x324   : > { %v874_v57 = vrot.slane %v872_v55, 4  ;;  %v877_v58 = vrot.slane %v875_v10, 5  ;;  %v926_v59 = vshrl.u32 %v884_v56, 16  ;;  %v929_v60 = vshll.u32 %v884_v56, 16 }
 0x326   : > { %v878_v61 = vor.u32 %v877_v58, %v874_v57  ;;  %v928_v62 = vrot.slane %v926_v59, 3  ;;  %v931_v63 = vrot.slane %v929_v60, 4  ;;  %v2392_v58 = vld [vmem:[%s2911_s3 + $0x120] sm:$0xff]  ;;  %v1063_v59 = vld [vmem:[#allocation4] sm:$0x8] }
 0x327   : > { %1217 = vmatpush.bf16.msrb.mxu1 %v2392_v58  ;;  %v1068_v60 = vunpack.c.l.b16 %v1063_v59  ;;  %v2426_v58 = vld [vmem:[%s2911_s3 + $0x230] sm:$0xff]  ;;  %v2425_v59 = vld [vmem:[%s2911_s3 + $0x228] sm:$0xff] }
 0x328   : > { %879 = vrot.lane.b32.xlu1 %v878_v61, %s2481_s23  ;;  %v932_v0 = vor.u32 %v931_v63, %v928_v62 }
 0x32a   : > { %2053 = vmatmul.msk.bf16.vlgmr.msrb.gmra.mxu3 %vm224_vm3, %v932_v0 }
 0x39a   : > { %v880_v5 = vpop.permute.xlu1 %879 }
 0x39b   : > { %v887_v6 = vsel %vm224_vm3, %v869_v4, %v880_v5 }
 0x39c   : > { %v918_v7 = vshrl.u32 %v887_v6, 16  ;;  %v921_v8 = vshll.u32 %v887_v6, 16 }
 0x39e   : > { %v920_v9 = vrot.slane %v918_v7, 3  ;;  %v923_v11 = vrot.slane %v921_v8, 4  ;;  %v2415_v7 = vld [vmem:[%s2911_s3 + $0x1d8] sm:$0xff]  ;;  %v2414_v8 = vld [vmem:[%s2911_s3 + $0x1d0] sm:$0xff] }
 0x39f   : > { %1407 = vmatpush.bf16.msra.mxu3 %v2415_v7 }
 0x3a0   : > { %v924_v12 = vor.u32 %v923_v11, %v920_v9  ;;  %v2413_v9 = vld [vmem:[%s2911_s3 + $0x1c8] sm:$0xff]  ;;  %v2412_v11 = vld [vmem:[%s2911_s3 + $0x1c0] sm:$0xff] }
 0x3a2   : > { %1017 = vmatmul.bf16.vlgmr.msrb.gmra.mxu2 %v924_v12  ;;  %v2461_v12 = vld [vmem:[%s2912_s4 + $0x3] ss:$0 sm:$0xff] }
 0x3a3   : > { %1408 = vmatpush.bf16.msra.mxu3 %v2414_v8  ;;  %v2420_v8 = vld [vmem:[%s2911_s3 + $0x200] sm:$0xff] }
 0x3a7   : > { %1409 = vmatpush.bf16.msra.mxu3 %v2413_v9  ;;  %v2419_v9 = vld [vmem:[%s2911_s3 + $0x1f8] sm:$0xff] }
 0x3ab   : > { %1410 = vmatpush.bf16.msra.mxu3 %v2412_v11  ;;  %v1422_v11 = vld [vmem:[#allocation4 + $0x8] sm:$0x1] }
 0x3ad   : > { %v1031_v13 = vpop.f32.mrf.mxu3 }
 0x3b5   : > { %v1033_v14 = vpop.f32.mrf.mxu3 }
 0x425   : > { %v1018_v21 = vpop.f32.mrf.mxu2 }
 0x426   : > { %v1019_v22 = vadd.f32 %v2460_v20, %v1018_v21  ;;  %v2409_v20 = vld [vmem:[%s2911_s3 + $0x1a8] sm:$0xff] }
 0x428   : > { %v1032_v23 = vadd.f32 %v1031_v13, %v1019_v22  ;;  %v2411_v13 = vld [vmem:[%s2911_s3 + $0x1b8] sm:$0xff] }
 0x429   : > { %1390 = vmatpush.bf16.msra.mxu2 %v2411_v13  ;;  %v2418_v13 = vld [vmem:[%s2911_s3 + $0x1f0] sm:$0xff] }
 0x42a   : > { %v1035_v24 = vmax.f32 %v1032_v23, 0.0 }
 0x42c   : > { %1036 = vst.msk [vmem:[#allocation2 + $0x8] sm:$0xff] %vm224_vm3, %v1035_v24 }
 0x42d   : > { %v1020_v25 = vpop.f32.mrf.mxu2  ;;  %1391 = vmatpush.bf16.msra.mxu2 %v2410_v15 }
 0x42e   : > { %v1245_v25 = vld [vmem:[#allocation3 + $0x8] sm:$0x1] }
 0x431   : > { %1392 = vmatpush.bf16.msra.mxu2 %v2409_v20 }
 0x433   : > { %v1037_v29 = vld [vmem:[#allocation2 + $0x7] ss:$2 sm:$0xf]  ;;  %v1038_v30 = vld [vmem:[#allocation2 + $0x8] ss:$2 sm:$0xf] }
 0x434   : > { %v1039_v31 = vld [vmem:[#allocation2 + $0x9] ss:$2 sm:$0xf]  ;;  %v1055_v32 = vsel %vm1052_vm5, 0.0, %v1037_v29  ;;  %v1263_v29 = vunpack.c.l.b16 %v1245_v25 }
 0x435   : > { %v1056_v33 = vmax.f32 %v1038_v30, %v1039_v31  ;;  %1393 = vmatpush.bf16.msra.mxu2 %v2408_v18 }
 0x437   : > { %v1057_v36 = vmax.f32 %v1056_v33, %v1055_v32 }
 0x439   : > { %v1058_v37 = vpack.c.bf16 %v1057_v36, %v1057_v36  ;;  %1394 = vmatpush.bf16.msra.mxu2 %v2407_v34 }
 0x43b   : > { %1060 = vst.msk [vmem:[#allocation4 + $0x4] sm:$0x1] %vm1059_vm6, %v1058_v37 }
 0x43d   : > { %1395 = vmatpush.bf16.msra.mxu2 %v2406_v26 }
 0x442   : > { %v1064_v43 = vld [vmem:[#allocation4 + $0x4] sm:$0xf] }
 0x443   : > { %v1069_v44 = vunpack.c.l.b16 %v1064_v43 }
 0x445   : > { %v1071_v45 = vpack.c.b16 %v1069_v44, %v1069_v44  ;;  %v1084_v46 = vpack.c.b16 %v1083_v41, %v1069_v44  ;;  %v1070_v61 = vpack.c.b16 %v1069_v44, %v1068_v60  ;;  %v2405_v44 = vld [vmem:[%s2911_s3 + $0x188] sm:$0xff]  ;;  %v2424_v60 = vld [vmem:[%s2911_s3 + $0x220] sm:$0xff] }
 0x446   : > { %1396 = vmatpush.bf16.msra.mxu2 %v2405_v44  ;;  %v2439_v44 = vld [vmem:[%s2911_s3 + $0x298] sm:$0xff] }
 0x447   : > { %v1073_v48 = vshrl.u32 %v1071_v45, 16  ;;  %v1076_v49 = vshll.u32 %v1071_v45, 16  ;;  %v1085_v50 = vrot.slane %v1084_v46, 5  ;;  %v2404_v45 = vld [vmem:[%s2911_s3 + $0x180] sm:$0xff]  ;;  %v1243_v46 = vld [vmem:[#allocation3] sm:$0x8] }
 0x448   : > { %v1248_v47 = vunpack.c.l.b16 %v1243_v46  ;;  %v2437_v46 = vld [vmem:[%s2911_s3 + $0x288] sm:$0xff] }
 0x449   : > { %v1075_v51 = vrot.slane %v1073_v48, 4  ;;  %v1078_v52 = vrot.slane %v1076_v49, 5  ;;  %v1127_v53 = vshrl.u32 %v1085_v50, 16  ;;  %v1130_v54 = vshll.u32 %v1085_v50, 16 }
 0x44a   : > { %1397 = vmatpush.bf16.msra.mxu2 %v2404_v45  ;;  %v2438_v45 = vld [vmem:[%s2911_s3 + $0x290] sm:$0xff] }
 0x44b   : > { %v1079_v55 = vor.u32 %v1078_v52, %v1075_v51  ;;  %v1129_v10 = vrot.slane %v1127_v53, 3  ;;  %v1132_v56 = vrot.slane %v1130_v54, 4 }
 0x44d   : > { %1080 = vrot.lane.b32.xlu2 %v1079_v55, %s2481_s23  ;;  %v1133_v57 = vor.u32 %v1132_v56, %v1129_v10 }
 0x44f   : > { %2127 = vmatmul.msk.bf16.vlgmr.msra.gmra.mxu0 %vm224_vm3, %v1133_v57  ;;  %v2427_v57 = vld [vmem:[%s2911_s3 + $0x238] sm:$0xff] }
 0x450   : > { %1584 = vmatpush.bf16.msra.mxu1 %v2427_v57 }
 0x454   : > { %1585 = vmatpush.bf16.msra.mxu1 %v2426_v58  ;;  %v2432_v58 = vld [vmem:[%s2911_s3 + $0x260] sm:$0xff] }
 0x458   : > { %1586 = vmatpush.bf16.msra.mxu1 %v2425_v59  ;;  %v2431_v59 = vld [vmem:[%s2911_s3 + $0x258] sm:$0xff] }
 0x45c   : > { %1587 = vmatpush.bf16.msra.mxu1 %v2424_v60  ;;  %v1599_v60 = vld [vmem:[#allocation3 + $0x8] sm:$0x1] }
 0x4a7   : > { %v1081_v62 = vpop.permute.xlu2 %1080 }
 0x4a8   : > { %v1088_v63 = vsel %vm224_vm3, %v1070_v61, %v1081_v62  ;;  %v2462_v61 = vld [vmem:[%s2912_s4 + $0x4] ss:$0 sm:$0xff]  ;;  %v2423_v62 = vld [vmem:[%s2911_s3 + $0x218] sm:$0xff] }
 0x4a9   : > { %v1119_v0 = vshrl.u32 %v1088_v63, 16  ;;  %v1122_v1 = vshll.u32 %v1088_v63, 16  ;;  %1567 = vmatpush.bf16.msrb.mxu0 %v2423_v62 }
 0x4ab   : > { %v1121_v2 = vrot.slane %v1119_v0, 3  ;;  %v1124_v3 = vrot.slane %v1122_v1, 4  ;;  %v2422_v0 = vld [vmem:[%s2911_s3 + $0x210] sm:$0xff] }
 0x4ad   : > { %v1125_v4 = vor.u32 %v1124_v3, %v1121_v2  ;;  %1568 = vmatpush.bf16.msrb.mxu0 %v2422_v0  ;;  %v2421_v3 = vld [vmem:[%s2911_s3 + $0x208] sm:$0xff] }
 0x4af   : > { %1218 = vmatmul.bf16.vlgmr.msrb.gmra.mxu1 %v1125_v4 }
 0x4b0   : > { %1761 = vmatpush.bf16.msrb.mxu1 %v2439_v44 }
 0x4b1   : > { %1569 = vmatpush.bf16.msrb.mxu0 %v2421_v3 }
 0x4b4   : > { %1762 = vmatpush.bf16.msrb.mxu1 %v2438_v45 }
 0x4b5   : > { %1570 = vmatpush.bf16.msrb.mxu0 %v2420_v8 }
 0x4b8   : > { %1763 = vmatpush.bf16.msrb.mxu1 %v2437_v46 }
 0x4b9   : > { %1571 = vmatpush.bf16.msrb.mxu0 %v2419_v9 }
 0x4bd   : > { %1572 = vmatpush.bf16.msrb.mxu0 %v2418_v13 }
 0x4cc   : > { %v1232_v5 = vpop.f32.mrf.mxu0 }
 0x4d4   : > { %v1234_v6 = vpop.f32.mrf.mxu0 }
 0x52c   : > { %v1219_v14 = vpop.f32.mrf.mxu1 }
 0x52d   : > { %v1220_v16 = vadd.f32 %v2461_v12, %v1219_v14  ;;  %v1440_v12 = vunpack.c.l.b16 %v1422_v11 }
 0x52f   : > { %v1233_v17 = vadd.f32 %v1232_v5, %v1220_v16 }
 0x531   : > { %v1236_v21 = vmax.f32 %v1233_v17, 0.0 }
 0x533   : > { %v1240_v22 = vsel %vm2777_vm7, %v1236_v21, 0.0 }
 0x534   : > { %v1241_v23 = vpack.c.bf16 %v1240_v22, %v1240_v22  ;;  %v1221_v24 = vpop.f32.mrf.mxu1 }
 0x536   : > { %1242 = vst.msk [vmem:[#allocation3 + $0x4] sm:$0xf] %vm226_vm4, %v1241_v23 }
 0x53d   : > { %v1244_v27 = vld [vmem:[#allocation3 + $0x4] sm:$0xf] }
 0x53e   : > { %v1249_v28 = vunpack.c.l.b16 %v1244_v27 }
 0x540   : > { %v1251_v30 = vpack.c.b16 %v1249_v28, %v1249_v28  ;;  %v1264_v31 = vpack.c.b16 %v1263_v29, %v1249_v28  ;;  %v1250_v48 = vpack.c.b16 %v1249_v28, %v1248_v47  ;;  %v2417_v29 = vld [vmem:[%s2911_s3 + $0x1e8] sm:$0xff]  ;;  %v2436_v47 = vld [vmem:[%s2911_s3 + $0x280] sm:$0xff] }
 0x541   : > { %1573 = vmatpush.bf16.msrb.mxu0 %v2417_v29  ;;  %1764 = vmatpush.bf16.msrb.mxu1 %v2436_v47 }
 0x542   : > { %v1253_v32 = vshrl.u32 %v1251_v30, 16  ;;  %v1256_v33 = vshll.u32 %v1251_v30, 16  ;;  %v1265_v35 = vrot.slane %v1264_v31, 5  ;;  %v2416_v30 = vld [vmem:[%s2911_s3 + $0x1e0] sm:$0xff]  ;;  %v1420_v31 = vld [vmem:[#allocation4] sm:$0x8] }
 0x544   : > { %v1255_v36 = vrot.slane %v1253_v32, 4  ;;  %v1258_v37 = vrot.slane %v1256_v33, 5  ;;  %v1307_v38 = vshrl.u32 %v1265_v35, 16  ;;  %v1310_v39 = vshll.u32 %v1265_v35, 16 }
 0x545   : > { %1574 = vmatpush.bf16.msrb.mxu0 %v2416_v30  ;;  %v1425_v32 = vunpack.c.l.b16 %v1420_v31 }
 0x546   : > { %v1259_v40 = vor.u32 %v1258_v37, %v1255_v36  ;;  %v1309_v41 = vrot.slane %v1307_v38, 3  ;;  %v1312_v42 = vrot.slane %v1310_v39, 4 }
 0x548   : > { %1260 = vrot.lane.b32.xlu2 %v1259_v40, %s2481_s23  ;;  %v1313_v43 = vor.u32 %v1312_v42, %v1309_v41 }
 0x54a   : > { %2201 = vmatmul.msk.bf16.vlgmr.msra.gmra.mxu3 %vm224_vm3, %v1313_v43 }
 0x5a2   : > { %v1261_v49 = vpop.permute.xlu2 %1260 }
 0x5a3   : > { %v1268_v50 = vsel %vm224_vm3, %v1250_v48, %v1261_v49  ;;  %v2463_v48 = vld [vmem:[%s2912_s4 + $0x5] ss:$0 sm:$0xff]  ;;  %v2435_v49 = vld [vmem:[%s2911_s3 + $0x278] sm:$0xff] }
 0x5a4   : > { %v1299_v51 = vshrl.u32 %v1268_v50, 16  ;;  %v1302_v52 = vshll.u32 %v1268_v50, 16  ;;  %1744 = vmatpush.bf16.msrb.mxu3 %v2435_v49 }
 0x5a6   : > { %v1301_v53 = vrot.slane %v1299_v51, 3  ;;  %v1304_v54 = vrot.slane %v1302_v52, 4  ;;  %v2434_v51 = vld [vmem:[%s2911_s3 + $0x270] sm:$0xff] }
 0x5a8   : > { %v1305_v55 = vor.u32 %v1304_v54, %v1301_v53  ;;  %1745 = vmatpush.bf16.msrb.mxu3 %v2434_v51  ;;  %v2433_v54 = vld [vmem:[%s2911_s3 + $0x268] sm:$0xff] }
 0x5aa   : > { %1398 = vmatmul.bf16.vlgmr.msra.gmra.mxu2 %v1305_v55 }
 0x5ac   : > { %1746 = vmatpush.bf16.msrb.mxu3 %v2433_v54 }
 0x5b0   : > { %1747 = vmatpush.bf16.msrb.mxu3 %v2432_v58 }
 0x5b4   : > { %1748 = vmatpush.bf16.msrb.mxu3 %v2431_v59 }
 0x5b8   : > { %1749 = vmatpush.bf16.msrb.mxu3 %v2430_v19 }
 0x5cd   : > { %v1412_v10 = vpop.f32.mrf.mxu3 }
 0x5d5   : > { %v1414_v56 = vpop.f32.mrf.mxu3 }
 0x62d   : > { %v1399_v63 = vpop.f32.mrf.mxu2 }
 0x62e   : > { %v1400_v1 = vadd.f32 %v2462_v61, %v1399_v63  ;;  %v1617_v63 = vunpack.c.l.b16 %v1599_v60 }
 0x630   : > { %v1413_v2 = vadd.f32 %v1412_v10, %v1400_v1 }
 0x632   : > { %v1416_v4 = vmax.f32 %v1413_v2, 0.0 }
 0x634   : > { %v1417_v5 = vsel %vm2777_vm7, %v1416_v4, 0.0 }
 0x635   : > { %v1418_v6 = vpack.c.bf16 %v1417_v5, %v1417_v5  ;;  %v1401_v7 = vpop.f32.mrf.mxu2 }
 0x637   : > { %1419 = vst.msk [vmem:[#allocation4 + $0x4] sm:$0xf] %vm226_vm4, %v1418_v6 }
 0x63e   : > { %v1421_v14 = vld [vmem:[#allocation4 + $0x4] sm:$0xf] }
 0x63f   : > { %v1426_v15 = vunpack.c.l.b16 %v1421_v14  ;;  %v2429_v14 = vld [vmem:[%s2911_s3 + $0x248] sm:$0xff] }
 0x640   : > { %1750 = vmatpush.bf16.msrb.mxu3 %v2429_v14 }
 0x641   : > { %v1428_v16 = vpack.c.b16 %v1426_v15, %v1426_v15  ;;  %v1441_v17 = vpack.c.b16 %v1440_v12, %v1426_v15  ;;  %v1427_v33 = vpack.c.b16 %v1426_v15, %v1425_v32  ;;  %v2428_v15 = vld [vmem:[%s2911_s3 + $0x240] sm:$0xff] }
 0x643   : > { %v1430_v20 = vshrl.u32 %v1428_v16, 16  ;;  %v1433_v21 = vshll.u32 %v1428_v16, 16  ;;  %v1442_v22 = vrot.slane %v1441_v17, 5  ;;  %v1597_v16 = vld [vmem:[#allocation3] sm:$0x8] }
 0x644   : > { %1751 = vmatpush.bf16.msrb.mxu3 %v2428_v15  ;;  %v1602_v17 = vunpack.c.l.b16 %v1597_v16 }
 0x645   : > { %v1432_v23 = vrot.slane %v1430_v20, 4  ;;  %v1435_v24 = vrot.slane %v1433_v21, 5  ;;  %v1484_v18 = vshrl.u32 %v1442_v22, 16  ;;  %v1487_v34 = vshll.u32 %v1442_v22, 16 }
 0x647   : > { %v1436_v25 = vor.u32 %v1435_v24, %v1432_v23  ;;  %v1486_v26 = vrot.slane %v1484_v18, 3  ;;  %v1489_v27 = vrot.slane %v1487_v34, 4 }
 0x649   : > { %1437 = vrot.lane.b32.xlu0 %v1436_v25, %s2481_s23  ;;  %v1490_v28 = vor.u32 %v1489_v27, %v1486_v26 }
 0x64b   : > { %2275 = vmatmul.msk.bf16.vlgmr.msra.gmra.mxu1 %vm224_vm3, %v1490_v28  ;;  %v2464_v28 = vld [vmem:[%s2912_s4 + $0x6] ss:$0 sm:$0xff] }
 0x6bb   : > { %v1438_v35 = vpop.permute.xlu0 %1437 }
 0x6bc   : > { %v1445_v36 = vsel %vm224_vm3, %v1427_v33, %v1438_v35 }
 0x6bd   : > { %v1476_v37 = vshrl.u32 %v1445_v36, 16  ;;  %v1479_v38 = vshll.u32 %v1445_v36, 16 }
 0x6bf   : > { %v1478_v39 = vrot.slane %v1476_v37, 3  ;;  %v1481_v40 = vrot.slane %v1479_v38, 4 }
 0x6c1   : > { %v1482_v41 = vor.u32 %v1481_v40, %v1478_v39 }
 0x6c3   : > { %1575 = vmatmul.bf16.vlgmr.msrb.gmra.mxu0 %v1482_v41 }
 0x6c8   : > { %v1589_v42 = vpop.f32.mrf.mxu1 }
 0x6d0   : > { %v1591_v43 = vpop.f32.mrf.mxu1 }
 0x740   : > { %v1576_v50 = vpop.f32.mrf.mxu0 }
 0x741   : > { %v1577_v52 = vadd.f32 %v2463_v48, %v1576_v50 }
 0x743   : > { %v1590_v53 = vadd.f32 %v1589_v42, %v1577_v52 }
 0x745   : > { %v1593_v55 = vmax.f32 %v1590_v53, 0.0 }
 0x747   : > { %v1594_v10 = vsel %vm2777_vm7, %v1593_v55, 0.0 }
 0x748   : > { %v1595_v56 = vpack.c.bf16 %v1594_v10, %v1594_v10  ;;  %v1578_v57 = vpop.f32.mrf.mxu0 }
 0x74a   : > { %1596 = vst.msk [vmem:[#allocation3 + $0x4] sm:$0xf] %vm226_vm4, %v1595_v56 }
 0x751   : > { %v1598_v61 = vld [vmem:[#allocation3 + $0x4] sm:$0xf] }
 0x752   : > { %v1603_v62 = vunpack.c.l.b16 %v1598_v61 }
 0x754   : > { %v1605_v0 = vpack.c.b16 %v1603_v62, %v1603_v62  ;;  %v1618_v1 = vpack.c.b16 %v1617_v63, %v1603_v62  ;;  %v1604_v20 = vpack.c.b16 %v1603_v62, %v1602_v17 }
 0x756   : > { %v1607_v2 = vshrl.u32 %v1605_v0, 16  ;;  %v1610_v3 = vshll.u32 %v1605_v0, 16  ;;  %v1619_v4 = vrot.slane %v1618_v1, 5 }
 0x758   : > { %v1609_v5 = vrot.slane %v1607_v2, 4  ;;  %v1612_v6 = vrot.slane %v1610_v3, 5  ;;  %v1661_v7 = vshrl.u32 %v1619_v4, 16  ;;  %v1664_v8 = vshll.u32 %v1619_v4, 16 }
 0x75a   : > { %v1613_v9 = vor.u32 %v1612_v6, %v1609_v5  ;;  %v1663_v11 = vrot.slane %v1661_v7, 3  ;;  %v1666_v12 = vrot.slane %v1664_v8, 4 }
 0x75c   : > { %1614 = vrot.lane.b32.xlu1 %v1613_v9, %s2481_s23  ;;  %v1667_v13 = vor.u32 %v1666_v12, %v1663_v11 }
 0x75e   : > { %2349 = vmatmul.msk.bf16.vlgmr.msrb.gmra.mxu1 %vm224_vm3, %v1667_v13 }
 0x7ce   : > { %v1615_v21 = vpop.permute.xlu1 %1614 }
 0x7cf   : > { %v1622_v22 = vsel %vm224_vm3, %v1604_v20, %v1615_v21 }
 0x7d0   : > { %v1653_v23 = vshrl.u32 %v1622_v22, 16  ;;  %v1656_v24 = vshll.u32 %v1622_v22, 16 }
 0x7d2   : > { %v1655_v18 = vrot.slane %v1653_v23, 3  ;;  %v1658_v34 = vrot.slane %v1656_v24, 4 }
 0x7d4   : > { %v1659_v25 = vor.u32 %v1658_v34, %v1655_v18 }
 0x7d6   : > { %1752 = vmatmul.bf16.vlgmr.msrb.gmra.mxu3 %v1659_v25 }
 0x7db   : > { %v1766_v26 = vpop.f32.mrf.mxu1 }
 0x7e3   : > { %v1768_v27 = vpop.f32.mrf.mxu1 }
 0x859   : > { %v1753_v29 = vpop.f32.mrf.mxu3 }
 0x85a   : > { %v1754_v30 = vadd.f32 %v2464_v28, %v1753_v29 }
 0x85c   : > { %v1767_v31 = vadd.f32 %v1766_v26, %v1754_v30 }
 0x85e   : > { %v1770_v32 = vmax.f32 %v1767_v31, 0.0 }
 0x860   : > { %1771 = vst.msk [vmem:[#allocation2 + $0x8] sm:$0xff] %vm224_vm3, %v1770_v32 }
 0x861   : > { %v1755_v33 = vpop.f32.mrf.mxu3 }
 0x867   : > { %v1773_v35 = vld [vmem:[#allocation2 + $0x9] ss:$2 sm:$0xf]  ;;  %v1772_v37 = vld [vmem:[#allocation2 + $0x8] ss:$2 sm:$0xf] }
 0x868   : > { %1775 = vrot.lane.b32.xlu2 %v1773_v35, %s2481_s23 }
 0x8c2   : > { %v1776_v36 = vpop.permute.xlu2 %1775 }
 0x8c3   : > { %v1778_v38 = vsel %vm224_vm3, %v1772_v37, %v1776_v36 }
 0x8c4   : > { %v1779_v39 = vpack.c.bf16 %v1778_v38, %v1778_v38 }
 0x8c6   : > { %1780 = vst [vmem:[%s222_s14] sm:$0x3] %v1779_v39 }
 0x8c7 PF: > { %s15_s18 = sadd.s32 1, %s2476_s18  }
 0x8c8   : > { %p12_p4 = scmp.ge.s32.totalorder %s15_s18, 4  }
 0x8ca   :  { %14 = sbr.rel (!%p12_p4) target bundleno = 1 (0x1), region = 88 }

</bundles_post_ra>
